<compile_context>
chip_gen: v7x
topology: tpu7x:2x2x1
jax: 0.10.0
libtpu: 0.0.40
codegen_flags: <defaults>
</compile_context>

<pallas_src>
import math

import jax
import jax.numpy as jnp
from jax.experimental import pallas as pl

# ---- small, forward-consistent synthetic config -----------------------------
B, S, H = 3, 8, 32            # 3 sentences (like the script), seq=8, hidden=32
NUM_HEADS = 4
HEAD_DIM = H // NUM_HEADS
FFN = 64
NUM_LAYERS = 2
VOCAB = 50
NUM_CLASSES_A = 3
NUM_CLASSES_B = 3
NUM_CLASSES = NUM_CLASSES_A + NUM_CLASSES_B
LN_EPS = 1e-12

N = B * S                     # flattened token count            = 24
R = B * NUM_HEADS * S         # head-replicated query row count  = 96


def _layernorm(x, g, b, eps=LN_EPS):
    mu = jnp.mean(x, axis=-1, keepdims=True)
    var = jnp.mean((x - mu) ** 2, axis=-1, keepdims=True)
    return (x - mu) * jax.lax.rsqrt(var + eps) * g + b


# -----------------------------------------------------------------------------
# Single fused kernel: embedding LN -> NUM_LAYERS encoder layers -> masked mean
# pooling -> fused (A|B) classification head.  No grid (whole problem fits in
# VMEM, so full-array blocks are used).
# -----------------------------------------------------------------------------
def fused_encoder_kernel(x_ref, bias_ref, hmq_ref, hm_ref, pool_ref,
                         emb_g_ref, emb_b_ref,
                         wqkv_ref, bqkv_ref, wo_ref, bo_ref,
                         ln1g_ref, ln1b_ref, w1_ref, b1_ref,
                         w2_ref, b2_ref, ln2g_ref, ln2b_ref,
                         wab_ref, bab_ref,
                         out_ref):
    x = _layernorm(x_ref[...], emb_g_ref[...], emb_b_ref[...])      # (N, H) f32
    bias = bias_ref[...]                                            # (R, N) additive mask
    hmq = hmq_ref[...]                                              # (R, H) head mask * 1/sqrt(d)
    hm = hm_ref[...]                                                # (R, H) head mask (0/1)

    for l in range(NUM_LAYERS):                                     # static unroll (L=2)
        # Fused Q|K|V projection: bf16 inputs, f32 MXU accumulation.
        qkv = jnp.dot(x.astype(jnp.bfloat16), wqkv_ref[l],
                      preferred_element_type=jnp.float32) + bqkv_ref[l]   # (N, 3H)
        q = qkv[:, 0 * H:1 * H]
        k = qkv[:, 1 * H:2 * H]
        v = qkv[:, 2 * H:3 * H]

        # All heads at once, without lane splitting: replicate q along sublanes
        # (one copy per head), zero non-head columns (scale pre-folded into the
        # mask), and let one A @ B^T matmul produce every head's score block.
        q_big = jnp.concatenate([q] * NUM_HEADS, axis=0) * hmq       # (R, H)
        scores = jax.lax.dot_general(
            q_big, k, (((1,), (1,)), ((), ())),
            preferred_element_type=jnp.float32) + bias               # (R, N)

        m = jnp.max(scores, axis=-1, keepdims=True)
        p = jnp.exp(scores - m)
        p = p * pl.reciprocal(jnp.sum(p, axis=-1, keepdims=True), approx=True)

        # Context for every head, then head-select and recombine with
        # tile-aligned sublane slices (no concat / transpose).
        ctx_full = jnp.dot(p, v, preferred_element_type=jnp.float32) * hm  # (R, H)
        ctx = ctx_full[0:N]
        for h in range(1, NUM_HEADS):
            ctx = ctx + ctx_full[h * N:(h + 1) * N]                  # (N, H)

        attn_out = jnp.dot(ctx.astype(jnp.bfloat16), wo_ref[l],
                           preferred_element_type=jnp.float32) + bo_ref[l]
        h1 = _layernorm(x + attn_out, ln1g_ref[l], ln1b_ref[l])

        inter = jnp.dot(h1.astype(jnp.bfloat16), w1_ref[l],
                        preferred_element_type=jnp.float32) + b1_ref[l]
        # TODO(synk): tanh-approx GELU (torch nn.GELU default is the exact erf form).
        inter = jax.nn.gelu(inter, approximate=True)
        ffn_out = jnp.dot(inter.astype(jnp.bfloat16), w2_ref[l],
                          preferred_element_type=jnp.float32) + b2_ref[l]
        x = _layernorm(h1 + ffn_out, ln2g_ref[l], ln2b_ref[l])

    # Masked mean pooling fused in while x is still resident in VMEM.
    # pool_ref is already mask / clamp(sum_mask, 1e-9), so pooling = one matmul.
    pooled = jnp.dot(pool_ref[...], x, preferred_element_type=jnp.float32)   # (B, H)

    # Both task heads fused into one matmul / one output store.
    out_ref[...] = (jnp.dot(pooled, wab_ref[...],
                            preferred_element_type=jnp.float32) + bab_ref[...])


# -----------------------------------------------------------------------------
# Deterministic parameter init (shapes follow the module's __init__ structure).
# Per-layer weights are stacked on a leading (NUM_LAYERS, ...) axis; matmul
# weights are stored in bfloat16, everything else in float32.
# -----------------------------------------------------------------------------
def init_params(key):
    def nrm(k, shape, dtype=jnp.float32):
        return (jax.random.normal(k, shape, jnp.float32) * 0.02).astype(dtype)

    keys = iter(jax.random.split(key, 8))
    params = {
        "word_emb": nrm(next(keys), (VOCAB, H)),
        "pos_emb": nrm(next(keys), (S, H)),
        "emb_ln_g": jnp.ones((1, H), jnp.float32),
        "emb_ln_b": jnp.zeros((1, H), jnp.float32),
        # classification_head_A / _B fused: Linear(hidden_size, 3) | Linear(hidden_size, 3)
        "cls_AB_w": nrm(next(keys), (H, NUM_CLASSES)),
        "cls_AB_b": jnp.zeros((1, NUM_CLASSES), jnp.float32),
        # stacked encoder-layer weights (Wq|Wk|Wv pre-fused into one matrix)
        "wqkv": nrm(next(keys), (NUM_LAYERS, H, 3 * H), jnp.bfloat16),
        "bqkv": jnp.zeros((NUM_LAYERS, 1, 3 * H), jnp.float32),
        "wo":   nrm(next(keys), (NUM_LAYERS, H, H), jnp.bfloat16),
        "bo":   jnp.zeros((NUM_LAYERS, 1, H), jnp.float32),
        "ln1g": jnp.ones((NUM_LAYERS, 1, H), jnp.float32),
        "ln1b": jnp.zeros((NUM_LAYERS, 1, H), jnp.float32),
        "w1":   nrm(next(keys), (NUM_LAYERS, H, FFN), jnp.bfloat16),
        "b1":   jnp.zeros((NUM_LAYERS, 1, FFN), jnp.float32),
        "w2":   nrm(next(keys), (NUM_LAYERS, FFN, H), jnp.bfloat16),
        "b2":   jnp.zeros((NUM_LAYERS, 1, H), jnp.float32),
        "ln2g": jnp.ones((NUM_LAYERS, 1, H), jnp.float32),
        "ln2b": jnp.zeros((NUM_LAYERS, 1, H), jnp.float32),
    }
    return params


# -----------------------------------------------------------------------------
# Full forward: embedding gather (XLA glue) + mask preprocessing, then ONE
# fused Pallas kernel that produces logits for BOTH tasks.
# -----------------------------------------------------------------------------
def multitask_forward(params, token_ids, attn_mask):
    # TODO(synk): HuggingFace tokenizer (string -> ids) and the pretrained
    # checkpoint have no Pallas equivalent; token_ids / attn_mask stand in for
    # tokenizer(sentences, padding=True, ...).  The embedding gather stays in
    # XLA glue (data-dependent gather over the vocab).
    x = jnp.take(params["word_emb"], token_ids, axis=0) + params["pos_emb"][None, :, :]
    x_flat = x.reshape(N, H).astype(jnp.float32)

    mask_flat = attn_mask.reshape(N)                       # token n -> mask[b, i]
    col_b = jnp.arange(N) // S                             # batch id of each key/token
    row_b = (jnp.arange(R) % N) // S                       # batch id of each (head, b, i) query row

    # Additive attention bias: 0 for same-sentence, non-padded keys; -1e9 otherwise.
    valid = (row_b[:, None] == col_b[None, :]) & (mask_flat[None, :] > 0.5)
    attn_bias = jnp.where(valid, 0.0, -1e9).astype(jnp.float32)          # (R, N)

    # Head column mask: hm[r, d] = 1 iff feature d belongs to the head of row r.
    # The query-side copy folds in the 1/sqrt(head_dim) score scale.
    hm = ((jnp.arange(R)[:, None] // N) ==
          (jnp.arange(H)[None, :] // HEAD_DIM)).astype(jnp.float32)      # (R, H)
    hmq = hm * (1.0 / math.sqrt(HEAD_DIM))

    # Pre-normalized pooling selector:
    # pool[b, n] = mask[b, n % S] / clamp(sum_mask[b], 1e-9) if token n is in sentence b.
    pool = ((jnp.arange(B)[:, None] == col_b[None, :]).astype(jnp.float32)
            * mask_flat[None, :].astype(jnp.float32))                    # (B, N)
    denom = jnp.maximum(jnp.sum(pool, axis=-1, keepdims=True), 1e-9)
    pool_norm = pool / denom

    logits_ab = pl.pallas_call(
        fused_encoder_kernel,
        out_shape=jax.ShapeDtypeStruct((B, NUM_CLASSES), jnp.float32),
    )(x_flat, attn_bias, hmq, hm, pool_norm,
      params["emb_ln_g"], params["emb_ln_b"],
      params["wqkv"], params["bqkv"], params["wo"], params["bo"],
      params["ln1g"], params["ln1b"], params["w1"], params["b1"],
      params["w2"], params["b2"], params["ln2g"], params["ln2b"],
      params["cls_AB_w"], params["cls_AB_b"])

    return logits_ab[:, :NUM_CLASSES_A], logits_ab[:, NUM_CLASSES_A:]


if __name__ == "__main__":
    key = jax.random.PRNGKey(0)
    key_params, key_tok = jax.random.split(key)

    params = init_params(key_params)

    # Deterministic synthetic "tokenized batch" for the 3 example sentences.
    token_ids = jax.random.randint(key_tok, (B, S), 0, VOCAB, dtype=jnp.int32)
    lengths = jnp.array([8, 5, 6], dtype=jnp.int32)                  # simulated padding
    attn_mask = (jnp.arange(S, dtype=jnp.int32)[None, :]
                 < lengths[:, None]).astype(jnp.float32)
    token_ids = token_ids * attn_mask.astype(jnp.int32)              # pad token id = 0

    fwd = jax.jit(multitask_forward)
    logits_A, logits_B = fwd(params, token_ids, attn_mask)           # one encoder pass, both heads
    jax.block_until_ready((logits_A, logits_B))

    assert logits_A.shape == (B, NUM_CLASSES_A)
    assert logits_B.shape == (B, NUM_CLASSES_B)
    assert bool(jnp.all(jnp.isfinite(logits_A))) and bool(jnp.all(jnp.isfinite(logits_B)))
    print("KERNEL_OK")
</pallas_src>

<mosaic_0001>
module attributes {stable_mosaic.version = 11 : i64} {
  func.func @fused_encoder_kernel(%arg0: memref<24x32xf32, #tpu.memory_space<vmem>>, %arg1: memref<96x24xf32, #tpu.memory_space<vmem>>, %arg2: memref<96x32xf32, #tpu.memory_space<vmem>>, %arg3: memref<96x32xf32, #tpu.memory_space<vmem>>, %arg4: memref<3x24xf32, #tpu.memory_space<vmem>>, %arg5: memref<1x32xf32, #tpu.memory_space<vmem>>, %arg6: memref<1x32xf32, #tpu.memory_space<vmem>>, %arg7: memref<2x32x96xbf16, #tpu.memory_space<vmem>>, %arg8: memref<2x1x96xf32, #tpu.memory_space<vmem>>, %arg9: memref<2x32x32xbf16, #tpu.memory_space<vmem>>, %arg10: memref<2x1x32xf32, #tpu.memory_space<vmem>>, %arg11: memref<2x1x32xf32, #tpu.memory_space<vmem>>, %arg12: memref<2x1x32xf32, #tpu.memory_space<vmem>>, %arg13: memref<2x32x64xbf16, #tpu.memory_space<vmem>>, %arg14: memref<2x1x64xf32, #tpu.memory_space<vmem>>, %arg15: memref<2x64x32xbf16, #tpu.memory_space<vmem>>, %arg16: memref<2x1x32xf32, #tpu.memory_space<vmem>>, %arg17: memref<2x1x32xf32, #tpu.memory_space<vmem>>, %arg18: memref<2x1x32xf32, #tpu.memory_space<vmem>>, %arg19: memref<32x6xf32, #tpu.memory_space<vmem>>, %arg20: memref<1x6xf32, #tpu.memory_space<vmem>>, %arg21: memref<3x6xf32, #tpu.memory_space<vmem>>) attributes {dimension_semantics = [], scalar_prefetch = 0 : i64, scratch_operands = 0 : i64, tpu.core_type = #tpu.core_type<tc>} {
    %c0 = arith.constant 0 : index
    %c0_0 = arith.constant 0 : index
    %0 = vector.load %arg0[%c0, %c0_0] : memref<24x32xf32, #tpu.memory_space<vmem>>, vector<24x32xf32>
    %c0_1 = arith.constant 0 : index
    %c0_2 = arith.constant 0 : index
    %1 = vector.load %arg5[%c0_1, %c0_2] : memref<1x32xf32, #tpu.memory_space<vmem>>, vector<1x32xf32>
    %c0_3 = arith.constant 0 : index
    %c0_4 = arith.constant 0 : index
    %2 = vector.load %arg6[%c0_3, %c0_4] : memref<1x32xf32, #tpu.memory_space<vmem>>, vector<1x32xf32>
    %cst = arith.constant dense<0.000000e+00> : vector<24xf32>
    %3 = vector.multi_reduction <add>, %0, %cst [1] : vector<24x32xf32> to vector<24xf32>
    %4 = vector.shape_cast %3 : vector<24xf32> to vector<24x1xf32>
    %cst_5 = arith.constant 3.200000e+01 : f32
    %5 = vector.broadcast %cst_5 : f32 to vector<24x1xf32>
    %6 = arith.divf %4, %5 : vector<24x1xf32>
    %7 = vector.broadcast %6 : vector<24x1xf32> to vector<24x32xf32>
    %8 = arith.subf %0, %7 : vector<24x32xf32>
    %9 = arith.mulf %8, %8 : vector<24x32xf32>
    %cst_6 = arith.constant dense<0.000000e+00> : vector<24xf32>
    %10 = vector.multi_reduction <add>, %9, %cst_6 [1] : vector<24x32xf32> to vector<24xf32>
    %11 = vector.shape_cast %10 : vector<24xf32> to vector<24x1xf32>
    %cst_7 = arith.constant 3.200000e+01 : f32
    %12 = vector.broadcast %cst_7 : f32 to vector<24x1xf32>
    %13 = arith.divf %11, %12 : vector<24x1xf32>
    %14 = vector.broadcast %6 : vector<24x1xf32> to vector<24x32xf32>
    %15 = arith.subf %0, %14 : vector<24x32xf32>
    %cst_8 = arith.constant 9.99999996E-13 : f32
    %16 = vector.broadcast %cst_8 : f32 to vector<24x1xf32>
    %17 = arith.addf %13, %16 : vector<24x1xf32>
    %18 = math.rsqrt %17 : vector<24x1xf32>
    %19 = vector.broadcast %18 : vector<24x1xf32> to vector<24x32xf32>
    %20 = arith.mulf %15, %19 : vector<24x32xf32>
    %21 = vector.broadcast %1 : vector<1x32xf32> to vector<24x32xf32>
    %22 = arith.mulf %20, %21 : vector<24x32xf32>
    %23 = vector.broadcast %2 : vector<1x32xf32> to vector<24x32xf32>
    %24 = arith.addf %22, %23 : vector<24x32xf32>
    %c0_9 = arith.constant 0 : index
    %c0_10 = arith.constant 0 : index
    %25 = vector.load %arg1[%c0_9, %c0_10] : memref<96x24xf32, #tpu.memory_space<vmem>>, vector<96x24xf32>
    %c0_11 = arith.constant 0 : index
    %c0_12 = arith.constant 0 : index
    %26 = vector.load %arg2[%c0_11, %c0_12] : memref<96x32xf32, #tpu.memory_space<vmem>>, vector<96x32xf32>
    %c0_13 = arith.constant 0 : index
    %c0_14 = arith.constant 0 : index
    %27 = vector.load %arg3[%c0_13, %c0_14] : memref<96x32xf32, #tpu.memory_space<vmem>>, vector<96x32xf32>
    %28 = arith.truncf %24 : vector<24x32xf32> to vector<24x32xbf16>
    %c0_15 = arith.constant 0 : index
    %c0_16 = arith.constant 0 : index
    %c0_17 = arith.constant 0 : index
    %29 = vector.load %arg7[%c0_15, %c0_16, %c0_17] : memref<2x32x96xbf16, #tpu.memory_space<vmem>>, vector<1x32x96xbf16>
    %30 = vector.shape_cast %29 : vector<1x32x96xbf16> to vector<32x96xbf16>
    %cst_18 = arith.constant dense<0.000000e+00> : vector<24x96xf32>
    %31 = tpu.matmul %28, %30, %cst_18 {dimension_numbers = #tpu.dot_dimension_numbers<[1], [0], [0], [1], [0, 0, 1, 1], [], []>} : vector<24x32xbf16>, vector<32x96xbf16>, vector<24x96xf32> -> vector<24x96xf32>
    %c0_19 = arith.constant 0 : index
    %c0_20 = arith.constant 0 : index
    %c0_21 = arith.constant 0 : index
    %32 = vector.load %arg8[%c0_19, %c0_20, %c0_21] : memref<2x1x96xf32, #tpu.memory_space<vmem>>, vector<1x1x96xf32>
    %33 = vector.shape_cast %32 : vector<1x1x96xf32> to vector<1x96xf32>
    %34 = vector.broadcast %33 : vector<1x96xf32> to vector<24x96xf32>
    %35 = arith.addf %31, %34 : vector<24x96xf32>
    %36 = vector.extract_strided_slice %35 {offsets = [0, 0], sizes = [24, 32], strides = [1, 1]} : vector<24x96xf32> to vector<24x32xf32>
    %37 = vector.extract_strided_slice %35 {offsets = [0, 32], sizes = [24, 32], strides = [1, 1]} : vector<24x96xf32> to vector<24x32xf32>
    %38 = vector.extract_strided_slice %35 {offsets = [0, 64], sizes = [24, 32], strides = [1, 1]} : vector<24x96xf32> to vector<24x32xf32>
    %39 = tpu.concatenate %36, %36, %36, %36 in 0 : vector<24x32xf32>, vector<24x32xf32>, vector<24x32xf32>, vector<24x32xf32> -> vector<96x32xf32>
    %40 = arith.mulf %39, %26 : vector<96x32xf32>
    %cst_22 = arith.constant dense<0.000000e+00> : vector<96x24xf32>
    %41 = tpu.matmul %40, %37, %cst_22 {dimension_numbers = #tpu.dot_dimension_numbers<[1], [1], [0], [0], [0, 0, 1, 0], [], []>} : vector<96x32xf32>, vector<24x32xf32>, vector<96x24xf32> -> vector<96x24xf32>
    %42 = arith.addf %41, %25 : vector<96x24xf32>
    %cst_23 = arith.constant dense<0xFF800000> : vector<96xf32>
    %43 = vector.multi_reduction <maximumf>, %42, %cst_23 [1] : vector<96x24xf32> to vector<96xf32>
    %44 = vector.shape_cast %43 : vector<96xf32> to vector<96x1xf32>
    %45 = vector.broadcast %44 : vector<96x1xf32> to vector<96x24xf32>
    %46 = arith.subf %42, %45 : vector<96x24xf32>
    %47 = math.exp %46 : vector<96x24xf32>
    %cst_24 = arith.constant dense<0.000000e+00> : vector<96xf32>
    %48 = vector.multi_reduction <add>, %47, %cst_24 [1] : vector<96x24xf32> to vector<96xf32>
    %49 = vector.shape_cast %48 : vector<96xf32> to vector<96x1xf32>
    %50 = tpu.reciprocal %49 {approx = true} : vector<96x1xf32> -> vector<96x1xf32>
    %51 = vector.broadcast %50 : vector<96x1xf32> to vector<96x24xf32>
    %52 = arith.mulf %47, %51 : vector<96x24xf32>
    %cst_25 = arith.constant dense<0.000000e+00> : vector<96x32xf32>
    %53 = tpu.matmul %52, %38, %cst_25 {dimension_numbers = #tpu.dot_dimension_numbers<[1], [0], [0], [1], [0, 0, 1, 1], [], []>} : vector<96x24xf32>, vector<24x32xf32>, vector<96x32xf32> -> vector<96x32xf32>
    %54 = arith.mulf %53, %27 : vector<96x32xf32>
    %55 = vector.extract_strided_slice %54 {offsets = [0, 0], sizes = [24, 32], strides = [1, 1]} : vector<96x32xf32> to vector<24x32xf32>
    %56 = vector.extract_strided_slice %54 {offsets = [24, 0], sizes = [24, 32], strides = [1, 1]} : vector<96x32xf32> to vector<24x32xf32>
    %57 = arith.addf %55, %56 : vector<24x32xf32>
    %58 = vector.extract_strided_slice %54 {offsets = [48, 0], sizes = [24, 32], strides = [1, 1]} : vector<96x32xf32> to vector<24x32xf32>
    %59 = arith.addf %57, %58 : vector<24x32xf32>
    %60 = vector.extract_strided_slice %54 {offsets = [72, 0], sizes = [24, 32], strides = [1, 1]} : vector<96x32xf32> to vector<24x32xf32>
    %61 = arith.addf %59, %60 : vector<24x32xf32>
    %62 = arith.truncf %61 : vector<24x32xf32> to vector<24x32xbf16>
    %c0_26 = arith.constant 0 : index
    %c0_27 = arith.constant 0 : index
    %c0_28 = arith.constant 0 : index
    %63 = vector.load %arg9[%c0_26, %c0_27, %c0_28] : memref<2x32x32xbf16, #tpu.memory_space<vmem>>, vector<1x32x32xbf16>
    %64 = vector.shape_cast %63 : vector<1x32x32xbf16> to vector<32x32xbf16>
    %cst_29 = arith.constant dense<0.000000e+00> : vector<24x32xf32>
    %65 = tpu.matmul %62, %64, %cst_29 {dimension_numbers = #tpu.dot_dimension_numbers<[1], [0], [0], [1], [0, 0, 1, 1], [], []>} : vector<24x32xbf16>, vector<32x32xbf16>, vector<24x32xf32> -> vector<24x32xf32>
    %c0_30 = arith.constant 0 : index
    %c0_31 = arith.constant 0 : index
    %c0_32 = arith.constant 0 : index
    %66 = vector.load %arg10[%c0_30, %c0_31, %c0_32] : memref<2x1x32xf32, #tpu.memory_space<vmem>>, vector<1x1x32xf32>
    %67 = vector.shape_cast %66 : vector<1x1x32xf32> to vector<1x32xf32>
    %68 = vector.broadcast %67 : vector<1x32xf32> to vector<24x32xf32>
    %69 = arith.addf %65, %68 : vector<24x32xf32>
    %70 = arith.addf %24, %69 : vector<24x32xf32>
    %c0_33 = arith.constant 0 : index
    %c0_34 = arith.constant 0 : index
    %c0_35 = arith.constant 0 : index
    %71 = vector.load %arg11[%c0_33, %c0_34, %c0_35] : memref<2x1x32xf32, #tpu.memory_space<vmem>>, vector<1x1x32xf32>
    %72 = vector.shape_cast %71 : vector<1x1x32xf32> to vector<1x32xf32>
    %c0_36 = arith.constant 0 : index
    %c0_37 = arith.constant 0 : index
    %c0_38 = arith.constant 0 : index
    %73 = vector.load %arg12[%c0_36, %c0_37, %c0_38] : memref<2x1x32xf32, #tpu.memory_space<vmem>>, vector<1x1x32xf32>
    %74 = vector.shape_cast %73 : vector<1x1x32xf32> to vector<1x32xf32>
    %cst_39 = arith.constant dense<0.000000e+00> : vector<24xf32>
    %75 = vector.multi_reduction <add>, %70, %cst_39 [1] : vector<24x32xf32> to vector<24xf32>
    %76 = vector.shape_cast %75 : vector<24xf32> to vector<24x1xf32>
    %cst_40 = arith.constant 3.200000e+01 : f32
    %77 = vector.broadcast %cst_40 : f32 to vector<24x1xf32>
    %78 = arith.divf %76, %77 : vector<24x1xf32>
    %79 = vector.broadcast %78 : vector<24x1xf32> to vector<24x32xf32>
    %80 = arith.subf %70, %79 : vector<24x32xf32>
    %81 = arith.mulf %80, %80 : vector<24x32xf32>
    %cst_41 = arith.constant dense<0.000000e+00> : vector<24xf32>
    %82 = vector.multi_reduction <add>, %81, %cst_41 [1] : vector<24x32xf32> to vector<24xf32>
    %83 = vector.shape_cast %82 : vector<24xf32> to vector<24x1xf32>
    %cst_42 = arith.constant 3.200000e+01 : f32
    %84 = vector.broadcast %cst_42 : f32 to vector<24x1xf32>
    %85 = arith.divf %83, %84 : vector<24x1xf32>
    %86 = vector.broadcast %78 : vector<24x1xf32> to vector<24x32xf32>
    %87 = arith.subf %70, %86 : vector<24x32xf32>
    %cst_43 = arith.constant 9.99999996E-13 : f32
    %88 = vector.broadcast %cst_43 : f32 to vector<24x1xf32>
    %89 = arith.addf %85, %88 : vector<24x1xf32>
    %90 = math.rsqrt %89 : vector<24x1xf32>
    %91 = vector.broadcast %90 : vector<24x1xf32> to vector<24x32xf32>
    %92 = arith.mulf %87, %91 : vector<24x32xf32>
    %93 = vector.broadcast %72 : vector<1x32xf32> to vector<24x32xf32>
    %94 = arith.mulf %92, %93 : vector<24x32xf32>
    %95 = vector.broadcast %74 : vector<1x32xf32> to vector<24x32xf32>
    %96 = arith.addf %94, %95 : vector<24x32xf32>
    %97 = arith.truncf %96 : vector<24x32xf32> to vector<24x32xbf16>
    %c0_44 = arith.constant 0 : index
    %c0_45 = arith.constant 0 : index
    %c0_46 = arith.constant 0 : index
    %98 = vector.load %arg13[%c0_44, %c0_45, %c0_46] : memref<2x32x64xbf16, #tpu.memory_space<vmem>>, vector<1x32x64xbf16>
    %99 = vector.shape_cast %98 : vector<1x32x64xbf16> to vector<32x64xbf16>
    %cst_47 = arith.constant dense<0.000000e+00> : vector<24x64xf32>
    %100 = tpu.matmul %97, %99, %cst_47 {dimension_numbers = #tpu.dot_dimension_numbers<[1], [0], [0], [1], [0, 0, 1, 1], [], []>} : vector<24x32xbf16>, vector<32x64xbf16>, vector<24x64xf32> -> vector<24x64xf32>
    %c0_48 = arith.constant 0 : index
    %c0_49 = arith.constant 0 : index
    %c0_50 = arith.constant 0 : index
    %101 = vector.load %arg14[%c0_48, %c0_49, %c0_50] : memref<2x1x64xf32, #tpu.memory_space<vmem>>, vector<1x1x64xf32>
    %102 = vector.shape_cast %101 : vector<1x1x64xf32> to vector<1x64xf32>
    %103 = vector.broadcast %102 : vector<1x64xf32> to vector<24x64xf32>
    %104 = arith.addf %100, %103 : vector<24x64xf32>
    %105 = arith.mulf %104, %104 : vector<24x64xf32>
    %106 = arith.mulf %104, %105 : vector<24x64xf32>
    %cst_51 = arith.constant 4.471500e-02 : f32
    %107 = vector.broadcast %cst_51 : f32 to vector<24x64xf32>
    %108 = arith.mulf %107, %106 : vector<24x64xf32>
    %109 = arith.addf %104, %108 : vector<24x64xf32>
    %cst_52 = arith.constant 0.797884583 : f32
    %110 = vector.broadcast %cst_52 : f32 to vector<24x64xf32>
    %111 = arith.mulf %110, %109 : vector<24x64xf32>
    %112 = math.tanh %111 : vector<24x64xf32>
    %cst_53 = arith.constant 1.000000e+00 : f32
    %113 = vector.broadcast %cst_53 : f32 to vector<24x64xf32>
    %114 = arith.addf %113, %112 : vector<24x64xf32>
    %cst_54 = arith.constant 5.000000e-01 : f32
    %115 = vector.broadcast %cst_54 : f32 to vector<24x64xf32>
    %116 = arith.mulf %115, %114 : vector<24x64xf32>
    %117 = arith.mulf %104, %116 : vector<24x64xf32>
    %118 = arith.truncf %117 : vector<24x64xf32> to vector<24x64xbf16>
    %c0_55 = arith.constant 0 : index
    %c0_56 = arith.constant 0 : index
    %c0_57 = arith.constant 0 : index
    %119 = vector.load %arg15[%c0_55, %c0_56, %c0_57] : memref<2x64x32xbf16, #tpu.memory_space<vmem>>, vector<1x64x32xbf16>
    %120 = vector.shape_cast %119 : vector<1x64x32xbf16> to vector<64x32xbf16>
    %cst_58 = arith.constant dense<0.000000e+00> : vector<24x32xf32>
    %121 = tpu.matmul %118, %120, %cst_58 {dimension_numbers = #tpu.dot_dimension_numbers<[1], [0], [0], [1], [0, 0, 1, 1], [], []>} : vector<24x64xbf16>, vector<64x32xbf16>, vector<24x32xf32> -> vector<24x32xf32>
    %c0_59 = arith.constant 0 : index
    %c0_60 = arith.constant 0 : index
    %c0_61 = arith.constant 0 : index
    %122 = vector.load %arg16[%c0_59, %c0_60, %c0_61] : memref<2x1x32xf32, #tpu.memory_space<vmem>>, vector<1x1x32xf32>
    %123 = vector.shape_cast %122 : vector<1x1x32xf32> to vector<1x32xf32>
    %124 = vector.broadcast %123 : vector<1x32xf32> to vector<24x32xf32>
    %125 = arith.addf %121, %124 : vector<24x32xf32>
    %126 = arith.addf %96, %125 : vector<24x32xf32>
    %c0_62 = arith.constant 0 : index
    %c0_63 = arith.constant 0 : index
    %c0_64 = arith.constant 0 : index
    %127 = vector.load %arg17[%c0_62, %c0_63, %c0_64] : memref<2x1x32xf32, #tpu.memory_space<vmem>>, vector<1x1x32xf32>
    %128 = vector.shape_cast %127 : vector<1x1x32xf32> to vector<1x32xf32>
    %c0_65 = arith.constant 0 : index
    %c0_66 = arith.constant 0 : index
    %c0_67 = arith.constant 0 : index
    %129 = vector.load %arg18[%c0_65, %c0_66, %c0_67] : memref<2x1x32xf32, #tpu.memory_space<vmem>>, vector<1x1x32xf32>
    %130 = vector.shape_cast %129 : vector<1x1x32xf32> to vector<1x32xf32>
    %cst_68 = arith.constant dense<0.000000e+00> : vector<24xf32>
    %131 = vector.multi_reduction <add>, %126, %cst_68 [1] : vector<24x32xf32> to vector<24xf32>
    %132 = vector.shape_cast %131 : vector<24xf32> to vector<24x1xf32>
    %cst_69 = arith.constant 3.200000e+01 : f32
    %133 = vector.broadcast %cst_69 : f32 to vector<24x1xf32>
    %134 = arith.divf %132, %133 : vector<24x1xf32>
    %135 = vector.broadcast %134 : vector<24x1xf32> to vector<24x32xf32>
    %136 = arith.subf %126, %135 : vector<24x32xf32>
    %137 = arith.mulf %136, %136 : vector<24x32xf32>
    %cst_70 = arith.constant dense<0.000000e+00> : vector<24xf32>
    %138 = vector.multi_reduction <add>, %137, %cst_70 [1] : vector<24x32xf32> to vector<24xf32>
    %139 = vector.shape_cast %138 : vector<24xf32> to vector<24x1xf32>
    %cst_71 = arith.constant 3.200000e+01 : f32
    %140 = vector.broadcast %cst_71 : f32 to vector<24x1xf32>
    %141 = arith.divf %139, %140 : vector<24x1xf32>
    %142 = vector.broadcast %134 : vector<24x1xf32> to vector<24x32xf32>
    %143 = arith.subf %126, %142 : vector<24x32xf32>
    %cst_72 = arith.constant 9.99999996E-13 : f32
    %144 = vector.broadcast %cst_72 : f32 to vector<24x1xf32>
    %145 = arith.addf %141, %144 : vector<24x1xf32>
    %146 = math.rsqrt %145 : vector<24x1xf32>
    %147 = vector.broadcast %146 : vector<24x1xf32> to vector<24x32xf32>
    %148 = arith.mulf %143, %147 : vector<24x32xf32>
    %149 = vector.broadcast %128 : vector<1x32xf32> to vector<24x32xf32>
    %150 = arith.mulf %148, %149 : vector<24x32xf32>
    %151 = vector.broadcast %130 : vector<1x32xf32> to vector<24x32xf32>
    %152 = arith.addf %150, %151 : vector<24x32xf32>
    %153 = arith.truncf %152 : vector<24x32xf32> to vector<24x32xbf16>
    %c1 = arith.constant 1 : index
    %c0_73 = arith.constant 0 : index
    %c0_74 = arith.constant 0 : index
    %154 = vector.load %arg7[%c1, %c0_73, %c0_74] : memref<2x32x96xbf16, #tpu.memory_space<vmem>>, vector<1x32x96xbf16>
    %155 = vector.shape_cast %154 : vector<1x32x96xbf16> to vector<32x96xbf16>
    %cst_75 = arith.constant dense<0.000000e+00> : vector<24x96xf32>
    %156 = tpu.matmul %153, %155, %cst_75 {dimension_numbers = #tpu.dot_dimension_numbers<[1], [0], [0], [1], [0, 0, 1, 1], [], []>} : vector<24x32xbf16>, vector<32x96xbf16>, vector<24x96xf32> -> vector<24x96xf32>
    %c1_76 = arith.constant 1 : index
    %c0_77 = arith.constant 0 : index
    %c0_78 = arith.constant 0 : index
    %157 = vector.load %arg8[%c1_76, %c0_77, %c0_78] : memref<2x1x96xf32, #tpu.memory_space<vmem>>, vector<1x1x96xf32>
    %158 = vector.shape_cast %157 : vector<1x1x96xf32> to vector<1x96xf32>
    %159 = vector.broadcast %158 : vector<1x96xf32> to vector<24x96xf32>
    %160 = arith.addf %156, %159 : vector<24x96xf32>
    %161 = vector.extract_strided_slice %160 {offsets = [0, 0], sizes = [24, 32], strides = [1, 1]} : vector<24x96xf32> to vector<24x32xf32>
    %162 = vector.extract_strided_slice %160 {offsets = [0, 32], sizes = [24, 32], strides = [1, 1]} : vector<24x96xf32> to vector<24x32xf32>
    %163 = vector.extract_strided_slice %160 {offsets = [0, 64], sizes = [24, 32], strides = [1, 1]} : vector<24x96xf32> to vector<24x32xf32>
    %164 = tpu.concatenate %161, %161, %161, %161 in 0 : vector<24x32xf32>, vector<24x32xf32>, vector<24x32xf32>, vector<24x32xf32> -> vector<96x32xf32>
    %165 = arith.mulf %164, %26 : vector<96x32xf32>
    %cst_79 = arith.constant dense<0.000000e+00> : vector<96x24xf32>
    %166 = tpu.matmul %165, %162, %cst_79 {dimension_numbers = #tpu.dot_dimension_numbers<[1], [1], [0], [0], [0, 0, 1, 0], [], []>} : vector<96x32xf32>, vector<24x32xf32>, vector<96x24xf32> -> vector<96x24xf32>
    %167 = arith.addf %166, %25 : vector<96x24xf32>
    %cst_80 = arith.constant dense<0xFF800000> : vector<96xf32>
    %168 = vector.multi_reduction <maximumf>, %167, %cst_80 [1] : vector<96x24xf32> to vector<96xf32>
    %169 = vector.shape_cast %168 : vector<96xf32> to vector<96x1xf32>
    %170 = vector.broadcast %169 : vector<96x1xf32> to vector<96x24xf32>
    %171 = arith.subf %167, %170 : vector<96x24xf32>
    %172 = math.exp %171 : vector<96x24xf32>
    %cst_81 = arith.constant dense<0.000000e+00> : vector<96xf32>
    %173 = vector.multi_reduction <add>, %172, %cst_81 [1] : vector<96x24xf32> to vector<96xf32>
    %174 = vector.shape_cast %173 : vector<96xf32> to vector<96x1xf32>
    %175 = tpu.reciprocal %174 {approx = true} : vector<96x1xf32> -> vector<96x1xf32>
    %176 = vector.broadcast %175 : vector<96x1xf32> to vector<96x24xf32>
    %177 = arith.mulf %172, %176 : vector<96x24xf32>
    %cst_82 = arith.constant dense<0.000000e+00> : vector<96x32xf32>
    %178 = tpu.matmul %177, %163, %cst_82 {dimension_numbers = #tpu.dot_dimension_numbers<[1], [0], [0], [1], [0, 0, 1, 1], [], []>} : vector<96x24xf32>, vector<24x32xf32>, vector<96x32xf32> -> vector<96x32xf32>
    %179 = arith.mulf %178, %27 : vector<96x32xf32>
    %180 = vector.extract_strided_slice %179 {offsets = [0, 0], sizes = [24, 32], strides = [1, 1]} : vector<96x32xf32> to vector<24x32xf32>
    %181 = vector.extract_strided_slice %179 {offsets = [24, 0], sizes = [24, 32], strides = [1, 1]} : vector<96x32xf32> to vector<24x32xf32>
    %182 = arith.addf %180, %181 : vector<24x32xf32>
    %183 = vector.extract_strided_slice %179 {offsets = [48, 0], sizes = [24, 32], strides = [1, 1]} : vector<96x32xf32> to vector<24x32xf32>
    %184 = arith.addf %182, %183 : vector<24x32xf32>
    %185 = vector.extract_strided_slice %179 {offsets = [72, 0], sizes = [24, 32], strides = [1, 1]} : vector<96x32xf32> to vector<24x32xf32>
    %186 = arith.addf %184, %185 : vector<24x32xf32>
    %187 = arith.truncf %186 : vector<24x32xf32> to vector<24x32xbf16>
    %c1_83 = arith.constant 1 : index
    %c0_84 = arith.constant 0 : index
    %c0_85 = arith.constant 0 : index
    %188 = vector.load %arg9[%c1_83, %c0_84, %c0_85] : memref<2x32x32xbf16, #tpu.memory_space<vmem>>, vector<1x32x32xbf16>
    %189 = vector.shape_cast %188 : vector<1x32x32xbf16> to vector<32x32xbf16>
    %cst_86 = arith.constant dense<0.000000e+00> : vector<24x32xf32>
    %190 = tpu.matmul %187, %189, %cst_86 {dimension_numbers = #tpu.dot_dimension_numbers<[1], [0], [0], [1], [0, 0, 1, 1], [], []>} : vector<24x32xbf16>, vector<32x32xbf16>, vector<24x32xf32> -> vector<24x32xf32>
    %c1_87 = arith.constant 1 : index
    %c0_88 = arith.constant 0 : index
    %c0_89 = arith.constant 0 : index
    %191 = vector.load %arg10[%c1_87, %c0_88, %c0_89] : memref<2x1x32xf32, #tpu.memory_space<vmem>>, vector<1x1x32xf32>
    %192 = vector.shape_cast %191 : vector<1x1x32xf32> to vector<1x32xf32>
    %193 = vector.broadcast %192 : vector<1x32xf32> to vector<24x32xf32>
    %194 = arith.addf %190, %193 : vector<24x32xf32>
    %195 = arith.addf %152, %194 : vector<24x32xf32>
    %c1_90 = arith.constant 1 : index
    %c0_91 = arith.constant 0 : index
    %c0_92 = arith.constant 0 : index
    %196 = vector.load %arg11[%c1_90, %c0_91, %c0_92] : memref<2x1x32xf32, #tpu.memory_space<vmem>>, vector<1x1x32xf32>
    %197 = vector.shape_cast %196 : vector<1x1x32xf32> to vector<1x32xf32>
    %c1_93 = arith.constant 1 : index
    %c0_94 = arith.constant 0 : index
    %c0_95 = arith.constant 0 : index
    %198 = vector.load %arg12[%c1_93, %c0_94, %c0_95] : memref<2x1x32xf32, #tpu.memory_space<vmem>>, vector<1x1x32xf32>
    %199 = vector.shape_cast %198 : vector<1x1x32xf32> to vector<1x32xf32>
    %cst_96 = arith.constant dense<0.000000e+00> : vector<24xf32>
    %200 = vector.multi_reduction <add>, %195, %cst_96 [1] : vector<24x32xf32> to vector<24xf32>
    %201 = vector.shape_cast %200 : vector<24xf32> to vector<24x1xf32>
    %cst_97 = arith.constant 3.200000e+01 : f32
    %202 = vector.broadcast %cst_97 : f32 to vector<24x1xf32>
    %203 = arith.divf %201, %202 : vector<24x1xf32>
    %204 = vector.broadcast %203 : vector<24x1xf32> to vector<24x32xf32>
    %205 = arith.subf %195, %204 : vector<24x32xf32>
    %206 = arith.mulf %205, %205 : vector<24x32xf32>
    %cst_98 = arith.constant dense<0.000000e+00> : vector<24xf32>
    %207 = vector.multi_reduction <add>, %206, %cst_98 [1] : vector<24x32xf32> to vector<24xf32>
    %208 = vector.shape_cast %207 : vector<24xf32> to vector<24x1xf32>
    %cst_99 = arith.constant 3.200000e+01 : f32
    %209 = vector.broadcast %cst_99 : f32 to vector<24x1xf32>
    %210 = arith.divf %208, %209 : vector<24x1xf32>
    %211 = vector.broadcast %203 : vector<24x1xf32> to vector<24x32xf32>
    %212 = arith.subf %195, %211 : vector<24x32xf32>
    %cst_100 = arith.constant 9.99999996E-13 : f32
    %213 = vector.broadcast %cst_100 : f32 to vector<24x1xf32>
    %214 = arith.addf %210, %213 : vector<24x1xf32>
    %215 = math.rsqrt %214 : vector<24x1xf32>
    %216 = vector.broadcast %215 : vector<24x1xf32> to vector<24x32xf32>
    %217 = arith.mulf %212, %216 : vector<24x32xf32>
    %218 = vector.broadcast %197 : vector<1x32xf32> to vector<24x32xf32>
    %219 = arith.mulf %217, %218 : vector<24x32xf32>
    %220 = vector.broadcast %199 : vector<1x32xf32> to vector<24x32xf32>
    %221 = arith.addf %219, %220 : vector<24x32xf32>
    %222 = arith.truncf %221 : vector<24x32xf32> to vector<24x32xbf16>
    %c1_101 = arith.constant 1 : index
    %c0_102 = arith.constant 0 : index
    %c0_103 = arith.constant 0 : index
    %223 = vector.load %arg13[%c1_101, %c0_102, %c0_103] : memref<2x32x64xbf16, #tpu.memory_space<vmem>>, vector<1x32x64xbf16>
    %224 = vector.shape_cast %223 : vector<1x32x64xbf16> to vector<32x64xbf16>
    %cst_104 = arith.constant dense<0.000000e+00> : vector<24x64xf32>
    %225 = tpu.matmul %222, %224, %cst_104 {dimension_numbers = #tpu.dot_dimension_numbers<[1], [0], [0], [1], [0, 0, 1, 1], [], []>} : vector<24x32xbf16>, vector<32x64xbf16>, vector<24x64xf32> -> vector<24x64xf32>
    %c1_105 = arith.constant 1 : index
    %c0_106 = arith.constant 0 : index
    %c0_107 = arith.constant 0 : index
    %226 = vector.load %arg14[%c1_105, %c0_106, %c0_107] : memref<2x1x64xf32, #tpu.memory_space<vmem>>, vector<1x1x64xf32>
    %227 = vector.shape_cast %226 : vector<1x1x64xf32> to vector<1x64xf32>
    %228 = vector.broadcast %227 : vector<1x64xf32> to vector<24x64xf32>
    %229 = arith.addf %225, %228 : vector<24x64xf32>
    %230 = arith.mulf %229, %229 : vector<24x64xf32>
    %231 = arith.mulf %229, %230 : vector<24x64xf32>
    %cst_108 = arith.constant 4.471500e-02 : f32
    %232 = vector.broadcast %cst_108 : f32 to vector<24x64xf32>
    %233 = arith.mulf %232, %231 : vector<24x64xf32>
    %234 = arith.addf %229, %233 : vector<24x64xf32>
    %cst_109 = arith.constant 0.797884583 : f32
    %235 = vector.broadcast %cst_109 : f32 to vector<24x64xf32>
    %236 = arith.mulf %235, %234 : vector<24x64xf32>
    %237 = math.tanh %236 : vector<24x64xf32>
    %cst_110 = arith.constant 1.000000e+00 : f32
    %238 = vector.broadcast %cst_110 : f32 to vector<24x64xf32>
    %239 = arith.addf %238, %237 : vector<24x64xf32>
    %cst_111 = arith.constant 5.000000e-01 : f32
    %240 = vector.broadcast %cst_111 : f32 to vector<24x64xf32>
    %241 = arith.mulf %240, %239 : vector<24x64xf32>
    %242 = arith.mulf %229, %241 : vector<24x64xf32>
    %243 = arith.truncf %242 : vector<24x64xf32> to vector<24x64xbf16>
    %c1_112 = arith.constant 1 : index
    %c0_113 = arith.constant 0 : index
    %c0_114 = arith.constant 0 : index
    %244 = vector.load %arg15[%c1_112, %c0_113, %c0_114] : memref<2x64x32xbf16, #tpu.memory_space<vmem>>, vector<1x64x32xbf16>
    %245 = vector.shape_cast %244 : vector<1x64x32xbf16> to vector<64x32xbf16>
    %cst_115 = arith.constant dense<0.000000e+00> : vector<24x32xf32>
    %246 = tpu.matmul %243, %245, %cst_115 {dimension_numbers = #tpu.dot_dimension_numbers<[1], [0], [0], [1], [0, 0, 1, 1], [], []>} : vector<24x64xbf16>, vector<64x32xbf16>, vector<24x32xf32> -> vector<24x32xf32>
    %c1_116 = arith.constant 1 : index
    %c0_117 = arith.constant 0 : index
    %c0_118 = arith.constant 0 : index
    %247 = vector.load %arg16[%c1_116, %c0_117, %c0_118] : memref<2x1x32xf32, #tpu.memory_space<vmem>>, vector<1x1x32xf32>
    %248 = vector.shape_cast %247 : vector<1x1x32xf32> to vector<1x32xf32>
    %249 = vector.broadcast %248 : vector<1x32xf32> to vector<24x32xf32>
    %250 = arith.addf %246, %249 : vector<24x32xf32>
    %251 = arith.addf %221, %250 : vector<24x32xf32>
    %c1_119 = arith.constant 1 : index
    %c0_120 = arith.constant 0 : index
    %c0_121 = arith.constant 0 : index
    %252 = vector.load %arg17[%c1_119, %c0_120, %c0_121] : memref<2x1x32xf32, #tpu.memory_space<vmem>>, vector<1x1x32xf32>
    %253 = vector.shape_cast %252 : vector<1x1x32xf32> to vector<1x32xf32>
    %c1_122 = arith.constant 1 : index
    %c0_123 = arith.constant 0 : index
    %c0_124 = arith.constant 0 : index
    %254 = vector.load %arg18[%c1_122, %c0_123, %c0_124] : memref<2x1x32xf32, #tpu.memory_space<vmem>>, vector<1x1x32xf32>
    %255 = vector.shape_cast %254 : vector<1x1x32xf32> to vector<1x32xf32>
    %cst_125 = arith.constant dense<0.000000e+00> : vector<24xf32>
    %256 = vector.multi_reduction <add>, %251, %cst_125 [1] : vector<24x32xf32> to vector<24xf32>
    %257 = vector.shape_cast %256 : vector<24xf32> to vector<24x1xf32>
    %cst_126 = arith.constant 3.200000e+01 : f32
    %258 = vector.broadcast %cst_126 : f32 to vector<24x1xf32>
    %259 = arith.divf %257, %258 : vector<24x1xf32>
    %260 = vector.broadcast %259 : vector<24x1xf32> to vector<24x32xf32>
    %261 = arith.subf %251, %260 : vector<24x32xf32>
    %262 = arith.mulf %261, %261 : vector<24x32xf32>
    %cst_127 = arith.constant dense<0.000000e+00> : vector<24xf32>
    %263 = vector.multi_reduction <add>, %262, %cst_127 [1] : vector<24x32xf32> to vector<24xf32>
    %264 = vector.shape_cast %263 : vector<24xf32> to vector<24x1xf32>
    %cst_128 = arith.constant 3.200000e+01 : f32
    %265 = vector.broadcast %cst_128 : f32 to vector<24x1xf32>
    %266 = arith.divf %264, %265 : vector<24x1xf32>
    %267 = vector.broadcast %259 : vector<24x1xf32> to vector<24x32xf32>
    %268 = arith.subf %251, %267 : vector<24x32xf32>
    %cst_129 = arith.constant 9.99999996E-13 : f32
    %269 = vector.broadcast %cst_129 : f32 to vector<24x1xf32>
    %270 = arith.addf %266, %269 : vector<24x1xf32>
    %271 = math.rsqrt %270 : vector<24x1xf32>
    %272 = vector.broadcast %271 : vector<24x1xf32> to vector<24x32xf32>
    %273 = arith.mulf %268, %272 : vector<24x32xf32>
    %274 = vector.broadcast %253 : vector<1x32xf32> to vector<24x32xf32>
    %275 = arith.mulf %273, %274 : vector<24x32xf32>
    %276 = vector.broadcast %255 : vector<1x32xf32> to vector<24x32xf32>
    %277 = arith.addf %275, %276 : vector<24x32xf32>
    %c0_130 = arith.constant 0 : index
    %c0_131 = arith.constant 0 : index
    %278 = vector.load %arg4[%c0_130, %c0_131] : memref<3x24xf32, #tpu.memory_space<vmem>>, vector<3x24xf32>
    %cst_132 = arith.constant dense<0.000000e+00> : vector<3x32xf32>
    %279 = tpu.matmul %278, %277, %cst_132 {dimension_numbers = #tpu.dot_dimension_numbers<[1], [0], [0], [1], [0, 0, 1, 1], [], []>} : vector<3x24xf32>, vector<24x32xf32>, vector<3x32xf32> -> vector<3x32xf32>
    %c0_133 = arith.constant 0 : index
    %c0_134 = arith.constant 0 : index
    %280 = vector.load %arg19[%c0_133, %c0_134] : memref<32x6xf32, #tpu.memory_space<vmem>>, vector<32x6xf32>
    %cst_135 = arith.constant dense<0.000000e+00> : vector<3x6xf32>
    %281 = tpu.matmul %279, %280, %cst_135 {dimension_numbers = #tpu.dot_dimension_numbers<[1], [0], [0], [1], [0, 0, 1, 1], [], []>} : vector<3x32xf32>, vector<32x6xf32>, vector<3x6xf32> -> vector<3x6xf32>
    %c0_136 = arith.constant 0 : index
    %c0_137 = arith.constant 0 : index
    %282 = vector.load %arg20[%c0_136, %c0_137] : memref<1x6xf32, #tpu.memory_space<vmem>>, vector<1x6xf32>
    %283 = vector.broadcast %282 : vector<1x6xf32> to vector<3x6xf32>
    %284 = arith.addf %281, %283 : vector<3x6xf32>
    %c0_138 = arith.constant 0 : index
    %c0_139 = arith.constant 0 : index
    %285 = vector.load %arg21[%c0_138, %c0_139] : memref<3x6xf32, #tpu.memory_space<vmem>>, vector<3x6xf32>
    tpu.vector_store %arg21[%c0_138, %c0_139], %284 {strides = array<i32>} : memref<3x6xf32, #tpu.memory_space<vmem>>, vector<3x6xf32>,
    return
  }
}

</mosaic_0001>

<bundles_post_ra>
// kernel: multitask_forward.1
= control target key start
LH: loop header
LB: loop body
LE: loop exit
PB: predicated region body
PF: predicated region fallthrough
CT: control target
= control target key end

     0   :  { %vm74_vm0 = vcmask 261120   ;;  %vm436_vm2 = vcmask 195584   ;;  %vm1048_vm3 = vcmask 523264   ;;  %vm3018_vm4 = vmmov 0   ;;  %s3858_s0 = inlined_call_operand.vmem [shape: f32[24,32], index: 0, kind: input, shape index: {}]   ;;  %s3859_s7 = inlined_call_operand.vmem [shape: bf16[2,32,96], index: 7, kind: input, shape index: {}]   ;;  %s3860_s5 = inlined_call_operand.vmem [shape: f32[1,32], index: 5, kind: input, shape index: {}]   ;;  %s3861_s6 = inlined_call_operand.vmem [shape: f32[1,32], index: 6, kind: input, shape index: {}]   ;;  %s3862_s8 = inlined_call_operand.vmem [shape: f32[2,1,96], index: 8, kind: input, shape index: {}]   ;;  %s3863_s2 = inlined_call_operand.vmem [shape: f32[96,32], index: 2, kind: input, shape index: {}]   ;;  %s3864_s1 = inlined_call_operand.vmem [shape: f32[96,24], index: 1, kind: input, shape index: {}]   ;;  %s3865_s9 = inlined_call_operand.vmem [shape: bf16[2,32,32], index: 9, kind: input, shape index: {}]   ;;  %s3866_s3 = inlined_call_operand.vmem [shape: f32[96,32], index: 3, kind: input, shape index: {}]   ;;  %s3867_s10 = inlined_call_operand.vmem [shape: f32[2,1,32], index: 10, kind: input, shape index: {}]   ;;  %s3868_s13 = inlined_call_operand.vmem [shape: bf16[2,32,64], index: 13, kind: input, shape index: {}]   ;;  %s3869_s11 = inlined_call_operand.vmem [shape: f32[2,1,32], index: 11, kind: input, shape index: {}]   ;;  %s3870_s12 = inlined_call_operand.vmem [shape: f32[2,1,32], index: 12, kind: input, shape index: {}]   ;;  %s3871_s15 = inlined_call_operand.vmem [shape: bf16[2,64,32], index: 15, kind: input, shape index: {}]   ;;  %s3872_s14 = inlined_call_operand.vmem [shape: f32[2,1,64], index: 14, kind: input, shape index: {}]   ;;  %s3873_s16 = inlined_call_operand.vmem [shape: f32[2,1,32], index: 16, kind: input, shape index: {}]   ;;  %s3874_s17 = inlined_call_operand.vmem [shape: f32[2,1,32], index: 17, kind: input, shape index: {}]   ;;  %s3875_s18 = inlined_call_operand.vmem [shape: f32[2,1,32], index: 18, kind: input, shape index: {}]   ;;  %s3876_s19 = inlined_call_operand.vmem [shape: f32[32,6], index: 19, kind: input, shape index: {}]   ;;  %s3877_s4 = inlined_call_operand.vmem [shape: f32[3,24], index: 4, kind: input, shape index: {}]   ;;  %s3878_s20 = inlined_call_operand.vmem [shape: f32[1,6], index: 20, kind: input, shape index: {}]   ;;  %s3879_s21 = inlined_call_operand.vmem [shape: f32[3,6], index: 21, kind: output, shape index: {}]  }
   0x1   :  { %3884 = sst [smem:[#allocation2_spill]] %s3858_s0  ;;  %vm3186_vm1 = vmpackc.low %vm74_vm0, %vm74_vm0  ;;  %vm2329_vm5 = vcmask 43008  }
   0x2   :  { %3885 = sst [smem:[#allocation3_spill]] %s3859_s7  ;;  %s3890_s26 = sld [smem:[#allocation2_spill]] }
   0x3   :  { %3886 = sst [smem:[#allocation4_spill]] %s3860_s5  ;;  %s3891_s30 = sld [smem:[#allocation3_spill]] }
   0x4   :  { %3887 = sst [smem:[#allocation5_spill]] %s3861_s6  ;;  %s3892_s24 = sld [smem:[#allocation4_spill]] }
   0x5   :  { %3888 = sst [smem:[#allocation6_spill]] %s3862_s8  ;;  %s3016_s7 = smov 64  }
   0x6   :  { %3889 = sst [smem:[#allocation7_spill]] %s3863_s2  ;;  %s3894_s28 = sld [smem:[#allocation6_spill]] }
   0x7   :  { %s3895_s8 = sld [smem:[#allocation7_spill]]  ;;  %s3015_s2 = smov 96  }
   0x8   :  { %v69_v0 = vld [vmem:[%s3890_s26] sm:$0xff]  ;;  %v71_v1 = vld [vmem:[%s3890_s26 + $0x10] sm:$0xff]  ;;  %v70_v2 = vld [vmem:[%s3890_s26 + $0x8] sm:$0xff]  ;;  %s3893_s26 = sld [smem:[#allocation5_spill]] }
   0x9   :  { %v75_v3 = vsel %vm74_vm0, %v69_v0, 0.0  ;;  %v81_v4 = vsel %vm74_vm0, %v71_v1, 0.0  ;;  %v78_v5 = vsel %vm74_vm0, %v70_v2, 0.0  ;;  %v2821_v21 = vld [vmem:[%s3891_s30] sm:$0xff]   ;;  %v2822_v22 = vld [vmem:[%s3891_s30 + $0x8] sm:$0xff]  }
   0xa   :  { %76 = vadd.xlane.f32.xlu0 %v75_v3  ;;  %82 = vadd.xlane.f32.xlu1 %v81_v4  ;;  %v2335_v34 = vld [vmem:[%s3892_s24] ss:$0 sm:$0xff] }
   0xb   :  { %2579 = vmatprep.subr.bf16.mxu0 %v2821_v21 }
   0xc   :  { %2580 = vmatpush3.bf16.msra.mxu0 %v2821_v21  ;;  %v2337_v48 = vld [vmem:[%s3894_s28] ss:$0 sm:$0xff] }
   0xd   :  { %2581 = vmatprep.subr.bf16.mxu0 %v2822_v22  ;;  %v145_v52 = vld [vmem:[%s3895_s8] sm:$0xff]  ;;  %v156_v21 = vld [vmem:[%s3895_s8 + $0x58] sm:$0xff] }
   0xe   :  { %79 = vadd.xlane.f32.xlu0 %v78_v5  ;;  %v2336_v40 = vld [vmem:[%s3893_s26] ss:$0 sm:$0xff]  ;;  %v148_v5 = vld [vmem:[%s3895_s8 + $0x18] sm:$0xff] }
   0xf   :  { %v2982_v62 = vld [vmem:[%s3895_s8 + $0x18] sm:$0xff] }
  0x10   :  { %2582 = vmatpush3.bf16.msra.mxu0 %v2822_v22 }
  0x97   :  { %v77_v6 = vpop.xlane.xlu0 %76  ;;  %v83_v7 = vpop.xlane.xlu1 %82 }
  0x98   :  { %v85_v8 = vmul.f32 0.03125, %v77_v6  ;;  %v87_v9 = vmul.f32 0.03125, %v83_v7  ;;  %v149_v6 = vld [vmem:[%s3895_s8 + $0x20] sm:$0xff] }
  0x9a   :  { %v88_v10 = vsub.f32 %v69_v0, %v85_v8  ;;  %v90_v11 = vsub.f32 %v71_v1, %v87_v9  ;;  %v146_v1 = vld [vmem:[%s3895_s8 + $0x8] sm:$0xff] }
  0x9b   :  { %v80_v12 = vpop.xlane.xlu0 %79  ;;  %v150_v9 = vld [vmem:[%s3895_s8 + $0x28] sm:$0xff] }
  0x9c   :  { %v86_v13 = vmul.f32 0.03125, %v80_v12  ;;  %v91_v14 = vmul.f32 %v88_v10, %v88_v10  ;;  %v93_v15 = vmul.f32 %v90_v11, %v90_v11 }
  0x9e   :  { %v89_v16 = vsub.f32 %v70_v2, %v86_v13  ;;  %v94_v17 = vsel %vm74_vm0, %v91_v14, 0.0  ;;  %v100_v18 = vsel %vm74_vm0, %v93_v15, 0.0  ;;  %v147_v2 = vld [vmem:[%s3895_s8 + $0x10] sm:$0xff]  ;;  %v152_v13 = vld [vmem:[%s3895_s8 + $0x38] sm:$0xff]  ;;  %v153_v14 = vld [vmem:[%s3895_s8 + $0x40] sm:$0xff] }
  0x9f   :  { %95 = vadd.xlane.f32.xlu1 %v94_v17  ;;  %v154_v17 = vld [vmem:[%s3895_s8 + $0x48] sm:$0xff] }
  0xa0   :  { %v92_v19 = vmul.f32 %v89_v16, %v89_v16 }
  0xa2   :  { %v97_v20 = vsel %vm74_vm0, %v92_v19, 0.0 }
  0xa3   :  { %101 = vadd.xlane.f32.xlu1 %v100_v18  ;;  %98 = vadd.xlane.f32.xlu0 %v97_v20  ;;  %v155_v18 = vld [vmem:[%s3895_s8 + $0x50] sm:$0xff] }
 0x12c   :  { %v96_v23 = vpop.xlane.xlu1 %95 }
 0x12d   :  { %v103_v24 = vmul.f32 0.03125, %v96_v23  ;;  %v134_v23 = vld [vmem:[%s3864_s1 + $0x8] sm:$0xff] }
 0x12f   :  { %v106_v25 = vadd.f32 1e-12, %v103_v24  ;;  %v133_v24 = vld [vmem:[%s3864_s1] sm:$0xff] }
 0x130   :  { %v102_v26 = vpop.xlane.xlu1 %101  ;;  %v99_v27 = vpop.xlane.xlu0 %98 }
 0x131   :  { %2841 = vrsqrt.f32 %v106_v25  ;;  %v105_v28 = vmul.f32 0.03125, %v102_v26  ;;  %v104_v29 = vmul.f32 0.03125, %v99_v27 }
 0x133   :  { %v108_v30 = vadd.f32 1e-12, %v105_v28  ;;  %v107_v31 = vadd.f32 1e-12, %v104_v29  ;;  %v136_v29 = vld [vmem:[%s3864_s1 + $0x18] sm:$0xff] }
 0x135   :  { %2843 = vrsqrt.f32 %v108_v30 }
 0x136   :  { %2845 = vrsqrt.f32 %v107_v31  ;;  %v135_v31 = vld [vmem:[%s3864_s1 + $0x10] sm:$0xff] }
 0x13b   :  { %v2842_v32 = vpop.eup %2841 }
 0x13c   :  { %v112_v33 = vmul.f32 %v2842_v32, %v88_v10  ;;  %v151_v10 = vld [vmem:[%s3895_s8 + $0x30] sm:$0xff] }
 0x13e   :  { %v121_v39 = vmul.f32 %v2335_v34, %v112_v33 }
 0x13f   :  { %v2844_v35 = vpop.eup %2843 }
 0x140   :  { %v2846_v36 = vpop.eup %2845  ;;  %v114_v37 = vmul.f32 %v2844_v35, %v90_v11  ;;  %v3159_v44 = vadd.f32 %v2336_v40, %v121_v39 }
 0x141   :  { %v113_v38 = vmul.f32 %v2846_v36, %v89_v16 }
 0x142   :  { %v123_v41 = vmul.f32 %v2335_v34, %v114_v37  ;;  %v138_v37 = vld [vmem:[%s3864_s1 + $0x28] sm:$0xff] }
 0x143   :  { %v122_v42 = vmul.f32 %v2335_v34, %v113_v38  ;;  %v137_v38 = vld [vmem:[%s3864_s1 + $0x20] sm:$0xff] }
 0x144   :  { %v3157_v43 = vadd.f32 %v2336_v40, %v123_v41 }
 0x145   :  { %v3161_v45 = vadd.f32 %v2336_v40, %v122_v42 }
 0x146   :  { %v170_v46 = vpack.c.bf16 %v3157_v43, %v3157_v43 }
 0x147   :  { %v169_v47 = vpack.c.bf16 %v3161_v45, %v3159_v44 }
 0x149   :  { %2583 = vmatprep.mubr.msk.bf16.mxu0 %vm74_vm0, %v169_v47 }
 0x14a   :  { %2584 = vmatmul.mubr.msk.bf16.vlgmr.msra.gmra.mrb[0].mxu0 %vm74_vm0, %v170_v46 }
 0x21d   :  { %v2585_v49 = vpop.f32.mrb[0].mxu0 }
 0x21e   :  { %v3172_v50 = vadd.f32 %v2585_v49, %v2337_v48  ;;  %v234_v51 = vpop.f32.mrb[1].mxu0  ;;  %v139_v49 = vld [vmem:[%s3864_s1 + $0x30] sm:$0xff] }
 0x21f   :  { %v235_v53 = vadd.f32 %v2337_v48, %v234_v51  ;;  %v2586_v54 = vpop.f32.mrb[2].mxu0 }
 0x220   :  { %267 = vrot.lane.b32.xlu1 %v3172_v50, %s3015_s2  ;;  %v237_v55 = vpop.f32.mrb[3].mxu0  ;;  %v250_v4 = vmul.f32 %v3172_v50, %v147_v2  ;;  %v253_v11 = vmul.f32 %v3172_v50, %v150_v9  ;;  %v256_v16 = vmul.f32 %v3172_v50, %v153_v14  ;;  %v259_v22 = vmul.f32 %v3172_v50, %v156_v21 }
 0x221   :  { %v238_v56 = vadd.f32 %v2337_v48, %v237_v55  ;;  %v248_v57 = vmul.f32 %v235_v53, %v145_v52  ;;  %v251_v7 = vmul.f32 %v235_v53, %v148_v5  ;;  %v254_v12 = vmul.f32 %v235_v53, %v151_v10  ;;  %v140_v48 = vld [vmem:[%s3864_s1 + $0x38] sm:$0xff] }
 0x222   :  { %v257_v19 = vmul.f32 %v235_v53, %v154_v17 }
 0x223   :  { %2593 = vmatprep.mubr.msk.f32.mxu1 %vm74_vm0, %v248_v57  ;;  %v3180_v58 = vpack.i.bf16 %v238_v56, %v235_v53  ;;  %v249_v3 = vmul.f32 %v238_v56, %v146_v1  ;;  %v252_v8 = vmul.f32 %v238_v56, %v149_v6  ;;  %v255_v15 = vmul.f32 %v238_v56, %v152_v13  ;;  %v142_v57 = vld [vmem:[%s3864_s1 + $0x48] sm:$0xff] }
 0x224   :  { %v258_v20 = vmul.f32 %v238_v56, %v155_v18 }
 0x225   :  { %2802 = vrot.lane.b32.xlu0 %v3180_v58, %s3015_s2 }
 0x292   :  { %v268_v0 = vpop.permute.xlu1 %267 }
 0x297   :  { %v2803_v59 = vpop.permute.xlu0 %2802 }
 0x298   :  { %v2805_v60 = vunpack.i.h.bf16 %v2803_v59  ;;  %v2804_v61 = vunpack.i.l.bf16 %v2803_v59  ;;  %v141_v59 = vld [vmem:[%s3864_s1 + $0x40] sm:$0xff] }
 0x29a   :  { %v2767_v63 = vpack.c.bf16 %v2805_v60, %v2804_v61 }
 0x29c   :  { %2769 = vmatprep.subr.msk.bf16.mxu1 %vm3186_vm1, %v2767_v63 }
 0x29d   :  { %2772 = vmatpush3.bf16.xpose.msk.msra.mxu1 %vm3186_vm1, %v2767_v63 }
 0x29e   :  { %2591 = vmatprep.subr.msk.mxu1 %vm74_vm0, %v268_v0 }
 0x2a5   :  { %2592 = vmatpush3.xpose.msk.msra.mxu1 %vm74_vm0, %v268_v0 }
 0x2a8   :  { %2594 = vmatmul.mubr.msk.f32.vlgmr.msra.gmra.mrb[0].mxu1 %vm74_vm0, %v249_v3  ;;  %v144_v3 = vld [vmem:[%s3864_s1 + $0x58] sm:$0xff] }
 0x2a9   :  { %2596 = vmatprep.mubr.msk.f32.mxu1 %vm74_vm0, %v250_v4  ;;  %v143_v4 = vld [vmem:[%s3864_s1 + $0x50] sm:$0xff] }
 0x2ac   :  { %2597 = vmatmul.mubr.msk.f32.gmra.mrb[2].mxu1 %vm74_vm0, %v251_v7 }
 0x2ad   :  { %2599 = vmatprep.mubr.msk.f32.mxu1 %vm74_vm0, %v252_v8 }
 0x2b0   :  { %2600 = vmatmul.mubr.msk.f32.gmra.mrb[4].mxu1 %vm74_vm0, %v253_v11 }
 0x2b1   :  { %2602 = vmatprep.mubr.msk.f32.mxu1 %vm74_vm0, %v254_v12 }
 0x2b4   :  { %2603 = vmatmul.mubr.msk.f32.gmra.mrb[6].mxu1 %vm74_vm0, %v255_v15 }
 0x2b5   :  { %2605 = vmatprep.mubr.msk.f32.mxu1 %vm74_vm0, %v256_v16 }
 0x2b8   :  { %2606 = vmatmul.mubr.msk.f32.gmra.mrb[8].mxu1 %vm74_vm0, %v257_v19 }
 0x2b9   :  { %2608 = vmatprep.mubr.msk.f32.mxu1 %vm74_vm0, %v258_v20 }
 0x2bc   :  { %2609 = vmatmul.mubr.msk.f32.gmra.mrb[10].mxu1 %vm74_vm0, %v259_v22 }
 0x37b   :  { %v2595_v25 = vpop.f32.mrb[0].mxu1 }
 0x37c   :  { %v383_v26 = vadd.f32 %v2595_v25, %v134_v23  ;;  %v377_v27 = vpop.f32.mrb[1].mxu1 }
 0x37d   :  { %v378_v28 = vadd.f32 %v377_v27, %v133_v24 }
 0x37e   :  { %v440_v30 = vsel %vm436_vm2, %v383_v26, -inf }
 0x37f   :  { %441 = vmax.xlane.f32.xlu0 %v440_v30  ;;  %v2598_v32 = vpop.f32.mrb[2].mxu1  ;;  %v437_v33 = vsel %vm436_vm2, %v378_v28, -inf }
 0x380   :  { %v393_v34 = vadd.f32 %v2598_v32, %v136_v29  ;;  %v387_v35 = vpop.f32.mrb[3].mxu1  ;;  %438 = vmax.xlane.f32.xlu1 %v437_v33 }
 0x381   :  { %v388_v36 = vadd.f32 %v387_v35, %v135_v31 }
 0x382   :  { %v446_v39 = vsel %vm436_vm2, %v393_v34, -inf }
 0x383   :  { %v2601_v40 = vpop.f32.mrb[4].mxu1  ;;  %v443_v41 = vsel %vm436_vm2, %v388_v36, -inf }
 0x384   :  { %v403_v42 = vadd.f32 %v2601_v40, %v138_v37  ;;  %v397_v46 = vpop.f32.mrb[5].mxu1  ;;  %444 = vmax.xlane.f32.xlu0 %v443_v41  ;;  %447 = vmax.xlane.f32.xlu1 %v446_v39 }
 0x385   :  { %v398_v47 = vadd.f32 %v397_v46, %v137_v38 }
 0x386   :  { %v452_v51 = vsel %vm436_vm2, %v403_v42, -inf }
 0x387   :  { %v2604_v52 = vpop.f32.mrb[6].mxu1  ;;  %v449_v53 = vsel %vm436_vm2, %v398_v47, -inf }
 0x388   :  { %v413_v54 = vadd.f32 %v2604_v52, %v140_v48  ;;  %v407_v55 = vpop.f32.mrb[7].mxu1  ;;  %450 = vmax.xlane.f32.xlu0 %v449_v53  ;;  %453 = vmax.xlane.f32.xlu1 %v452_v51 }
 0x389   :  { %v408_v56 = vadd.f32 %v407_v55, %v139_v49 }
 0x38a   :  { %v458_v60 = vsel %vm436_vm2, %v413_v54, -inf }
 0x38b   :  { %v2607_v61 = vpop.f32.mrb[8].mxu1  ;;  %v455_v63 = vsel %vm436_vm2, %v408_v56, -inf }
 0x38c   :  { %v3282_v0 = vadd.f32 %v2607_v61, %v142_v57  ;;  %v417_v1 = vpop.f32.mrb[9].mxu1  ;;  %456 = vmax.xlane.f32.xlu0 %v455_v63  ;;  %459 = vmax.xlane.f32.xlu1 %v458_v60 }
 0x38d   :  { %v418_v2 = vadd.f32 %v417_v1, %v141_v59 }
 0x38e   :  { %v464_v5 = vsel %vm436_vm2, %v3282_v0, -inf }
 0x38f   :  { %v2610_v6 = vpop.f32.mrb[10].mxu1  ;;  %v461_v7 = vsel %vm436_vm2, %v418_v2, -inf }
 0x390   :  { %v3293_v8 = vadd.f32 %v2610_v6, %v144_v3  ;;  %v427_v9 = vpop.f32.mrb[11].mxu1  ;;  %462 = vmax.xlane.f32.xlu0 %v461_v7  ;;  %465 = vmax.xlane.f32.xlu1 %v464_v5 }
 0x391   :  { %v3295_v10 = vadd.f32 %v427_v9, %v143_v4 }
 0x392   :  { %v470_v11 = vsel %vm436_vm2, %v3293_v8, -inf }
 0x393   :  { %v467_v12 = vsel %vm436_vm2, %v3295_v10, -inf }
 0x394   :  { %468 = vmax.xlane.f32.xlu0 %v467_v12  ;;  %471 = vmax.xlane.f32.xlu1 %v470_v11 }
 0x40c   :  { %v442_v13 = vpop.xlane.xlu0 %441 }
 0x40d   :  { %v474_v14 = vsub.f32 %v383_v26, %v442_v13  ;;  %v439_v15 = vpop.xlane.xlu1 %438 }
 0x40e   :  { %v473_v16 = vsub.f32 %v378_v28, %v439_v15 }
 0x40f   :  { %v487_v17 = vmul.f32 1.442695, %v474_v14 }
 0x410   :  { %v485_v18 = vmul.f32 1.442695, %v473_v16 }
 0x411   :  { %2847 = vpow2.f32 %v487_v17  ;;  %v445_v19 = vpop.xlane.xlu0 %444  ;;  %v448_v20 = vpop.xlane.xlu1 %447 }
 0x412   :  { %2849 = vpow2.f32 %v485_v18  ;;  %v475_v21 = vsub.f32 %v388_v36, %v445_v19  ;;  %v476_v22 = vsub.f32 %v393_v34, %v448_v20 }
 0x414   :  { %v489_v23 = vmul.f32 1.442695, %v475_v21  ;;  %v491_v24 = vmul.f32 1.442695, %v476_v22 }
 0x415   :  { %v451_v25 = vpop.xlane.xlu0 %450  ;;  %v454_v27 = vpop.xlane.xlu1 %453 }
 0x416   :  { %2851 = vpow2.f32 %v489_v23  ;;  %v477_v29 = vsub.f32 %v398_v47, %v451_v25  ;;  %v478_v30 = vsub.f32 %v403_v42, %v454_v27 }
 0x417   :  { %2853 = vpow2.f32 %v491_v24 }
 0x418   :  { %v493_v31 = vmul.f32 1.442695, %v477_v29  ;;  %v495_v26 = vmul.f32 1.442695, %v478_v30 }
 0x419   :  { %v457_v32 = vpop.xlane.xlu0 %456  ;;  %v460_v28 = vpop.xlane.xlu1 %459 }
 0x41a   :  { %2855 = vpow2.f32 %v493_v31  ;;  %v479_v33 = vsub.f32 %v408_v56, %v457_v32  ;;  %v480_v35 = vsub.f32 %v413_v54, %v460_v28 }
 0x41b   :  { %v3301_v37 = vpop.eup %2847  ;;  %2857 = vpow2.f32 %v495_v26 }
 0x41c   :  { %v3303_v36 = vpop.eup %2849  ;;  %v497_v34 = vmul.f32 1.442695, %v479_v33  ;;  %v499_v38 = vmul.f32 1.442695, %v480_v35  ;;  %v512_v39 = vsel %vm436_vm2, %v3301_v37, 0.0 }
 0x41d   :  { %v463_v40 = vpop.xlane.xlu0 %462  ;;  %513 = vadd.xlane.f32.xlu1 %v512_v39  ;;  %v466_v41 = vpop.xlane.xlu1 %465  ;;  %v509_v42 = vsel %vm436_vm2, %v3303_v36, 0.0 }
 0x41e   :  { %2859 = vpow2.f32 %v497_v34  ;;  %v481_v46 = vsub.f32 %v418_v2, %v463_v40  ;;  %v482_v47 = vsub.f32 %v3282_v0, %v466_v41  ;;  %510 = vadd.xlane.f32.xlu0 %v509_v42 }
 0x41f   :  { %2861 = vpow2.f32 %v499_v38 }
 0x420   :  { %v3310_v48 = vpop.eup %2851  ;;  %v501_v49 = vmul.f32 1.442695, %v481_v46  ;;  %v503_v51 = vmul.f32 1.442695, %v482_v47 }
 0x421   :  { %v3312_v52 = vpop.eup %2853  ;;  %v469_v53 = vpop.xlane.xlu0 %468  ;;  %v515_v55 = vsel %vm436_vm2, %v3310_v48, 0.0 }
 0x422   :  { %v472_v54 = vpop.xlane.xlu1 %471  ;;  %2863 = vpow2.f32 %v501_v49  ;;  %v483_v56 = vsub.f32 %v3295_v10, %v469_v53  ;;  %516 = vadd.xlane.f32.xlu0 %v515_v55  ;;  %v518_v59 = vsel %vm436_vm2, %v3312_v52, 0.0 }
 0x423   :  { %v484_v57 = vsub.f32 %v3293_v8, %v472_v54  ;;  %2865 = vpow2.f32 %v503_v51  ;;  %519 = vadd.xlane.f32.xlu1 %v518_v59  ;;  %v2823_v59 = vld [vmem:[%s3865_s9] sm:$0xff]  }
 0x424   :  { %v3320_v60 = vpop.eup %2855  ;;  %v505_v0 = vmul.f32 1.442695, %v483_v56  ;;  %2635 = vmatprep.subr.bf16.mxu1 %v2823_v59 }
 0x425   :  { %v507_v61 = vmul.f32 1.442695, %v484_v57  ;;  %v3322_v63 = vpop.eup %2857  ;;  %v521_v1 = vsel %vm436_vm2, %v3320_v60, 0.0  ;;  %2636 = vmatpush3.bf16.msra.mxu1 %v2823_v59 }
 0x426   :  { %522 = vadd.xlane.f32.xlu0 %v521_v1  ;;  %v524_v2 = vsel %vm436_vm2, %v3322_v63, 0.0  ;;  %v160_v1 = vld [vmem:[%s3866_s3 + $0x18] sm:$0xff] }
 0x427   :  { %2867 = vpow2.f32 %v507_v61  ;;  %525 = vadd.xlane.f32.xlu1 %v524_v2 }
 0x428   :  { %v3328_v3 = vpop.eup %2859  ;;  %2869 = vpow2.f32 %v505_v0  ;;  %v157_v0 = vld [vmem:[%s3866_s3] sm:$0xff] }
 0x429   :  { %v3330_v4 = vpop.eup %2861  ;;  %v527_v5 = vsel %vm436_vm2, %v3328_v3, 0.0 }
 0x42a   :  { %528 = vadd.xlane.f32.xlu0 %v527_v5  ;;  %v530_v6 = vsel %vm436_vm2, %v3330_v4, 0.0 }
 0x42b   :  { %531 = vadd.xlane.f32.xlu1 %v530_v6  ;;  %v159_v6 = vld [vmem:[%s3866_s3 + $0x10] sm:$0xff] }
 0x42c   :  { %v3336_v7 = vpop.eup %2863 }
 0x42d   :  { %v3338_v8 = vpop.eup %2865  ;;  %v533_v9 = vsel %vm436_vm2, %v3336_v7, 0.0 }
 0x42e   :  { %534 = vadd.xlane.f32.xlu0 %v533_v9  ;;  %v536_v10 = vsel %vm436_vm2, %v3338_v8, 0.0 }
 0x42f   :  { %537 = vadd.xlane.f32.xlu1 %v536_v10  ;;  %v161_v10 = vld [vmem:[%s3866_s3 + $0x20] sm:$0xff] }
 0x431   :  { %v3344_v11 = vpop.eup %2867 }
 0x432   :  { %v542_v12 = vsel %vm436_vm2, %v3344_v11, 0.0  ;;  %v3348_v13 = vpop.eup %2869 }
 0x433   :  { %543 = vadd.xlane.f32.xlu0 %v542_v12  ;;  %v539_v14 = vsel %vm436_vm2, %v3348_v13, 0.0 }
 0x437   :  { %540 = vadd.xlane.f32.xlu0 %v539_v14 }
 0x440   :  { %2807 = vrot.lane.b32.xlu1 %v3180_v58, %s3016_s7 }
 0x44d   :  { %573 = vrot.lane.b32.xlu0 %v3172_v50, %s3016_s7 }
 0x4aa   :  { %v514_v15 = vpop.xlane.xlu1 %513 }
 0x4ab   :  { %v511_v16 = vpop.xlane.xlu0 %510 }
 0x4ac   :  { %2871 = vrcp.f32 %v511_v16 }
 0x4ad   :  { %2873 = vrcp.f32 %v514_v15 }
 0x4af   :  { %v517_v17 = vpop.xlane.xlu0 %516 }
 0x4b0   :  { %v520_v18 = vpop.xlane.xlu1 %519  ;;  %2875 = vrcp.f32 %v517_v17  ;;  %v164_v17 = vld [vmem:[%s3866_s3 + $0x38] sm:$0xff] }
 0x4b1   :  { %2877 = vrcp.f32 %v520_v18 }
 0x4b3   :  { %v523_v19 = vpop.xlane.xlu0 %522 }
 0x4b4   :  { %v526_v20 = vpop.xlane.xlu1 %525  ;;  %2879 = vrcp.f32 %v523_v19  ;;  %v163_v19 = vld [vmem:[%s3866_s3 + $0x30] sm:$0xff] }
 0x4b5   :  { %2881 = vrcp.f32 %v526_v20 }
 0x4b6   :  { %v2872_v21 = vpop.eup %2871 }
 0x4b7   :  { %v529_v22 = vpop.xlane.xlu0 %528  ;;  %v557_v23 = vmul.f32 %v2872_v21, %v3303_v36  ;;  %v2874_v32 = vpop.eup %2873 }
 0x4b8   :  { %v532_v24 = vpop.xlane.xlu1 %531  ;;  %2883 = vrcp.f32 %v529_v22  ;;  %v558_v35 = vmul.f32 %v2874_v32, %v3301_v37  ;;  %v168_v32 = vld [vmem:[%s3866_s3 + $0x58] sm:$0xff] }
 0x4b9   :  { %2617 = vmatprep.mubr.msk.f32.mxu0 %vm436_vm2, %v557_v23  ;;  %2885 = vrcp.f32 %v532_v24 }
 0x4ba   :  { %v2876_v28 = vpop.eup %2875 }
 0x4bb   :  { %v535_v25 = vpop.xlane.xlu0 %534  ;;  %v2878_v36 = vpop.eup %2877  ;;  %v559_v34 = vmul.f32 %v2876_v28, %v3310_v48 }
 0x4bc   :  { %v538_v58 = vpop.xlane.xlu1 %537  ;;  %2887 = vrcp.f32 %v535_v25  ;;  %v560_v39 = vmul.f32 %v2878_v36, %v3312_v52  ;;  %v166_v25 = vld [vmem:[%s3866_s3 + $0x48] sm:$0xff] }
 0x4bd   :  { %2889 = vrcp.f32 %v538_v58 }
 0x4be   :  { %v2880_v38 = vpop.eup %2879 }
 0x4bf   :  { %v2882_v40 = vpop.eup %2881  ;;  %v561_v41 = vmul.f32 %v2880_v38, %v3320_v60  ;;  %v2824_v60 = vld [vmem:[%s3865_s9 + $0x8] sm:$0xff]  }
 0x4c0   :  { %v544_v50 = vpop.xlane.xlu0 %543  ;;  %v2808_v27 = vpop.permute.xlu1 %2807  ;;  %v562_v37 = vmul.f32 %v2882_v40, %v3322_v63  ;;  %2637 = vmatprep.subr.bf16.mxu1 %v2824_v60 }
 0x4c1   :  { %v2810_v29 = vunpack.i.h.bf16 %v2808_v27  ;;  %v2809_v30 = vunpack.i.l.bf16 %v2808_v27  ;;  %2638 = vmatpush3.bf16.msra.mxu1 %v2824_v60 }
 0x4c2   :  { %v2884_v42 = vpop.eup %2883 }
 0x4c3   :  { %v2773_v31 = vpack.c.bf16 %v2810_v29, %v2809_v30  ;;  %v2886_v46 = vpop.eup %2885  ;;  %v563_v47 = vmul.f32 %v2884_v42, %v3328_v3 }
 0x4c4   :  { %v541_v26 = vpop.xlane.xlu0 %540  ;;  %v564_v49 = vmul.f32 %v2886_v46, %v3330_v4  ;;  %v2369_v46 = vld [vmem:[%s3867_s10] ss:$0 sm:$0xff] }
 0x4c5   :  { %2774 = vmatprep.subr.bf16.mxu0 %v2773_v31  ;;  %2891 = vrcp.f32 %v541_v26 }
 0x4c6   :  { %2776 = vmatpush3.bf16.msra.mxu0 %v2773_v31  ;;  %2893 = vrcp.f32 %v544_v50  ;;  %v2888_v48 = vpop.eup %2887  ;;  %v165_v50 = vld [vmem:[%s3866_s3 + $0x40] sm:$0xff] }
 0x4c7   :  { %v2890_v51 = vpop.eup %2889  ;;  %v565_v52 = vmul.f32 %v2888_v48, %v3336_v7  ;;  %v162_v7 = vld [vmem:[%s3866_s3 + $0x28] sm:$0xff] }
 0x4c8   :  { %v574_v33 = vpop.permute.xlu0 %573  ;;  %v566_v54 = vmul.f32 %v2890_v51, %v3338_v8  ;;  %v158_v8 = vld [vmem:[%s3866_s3 + $0x8] sm:$0xff] }
 0x4c9   :  { %2615 = vmatprep.subr.mxu0 %v574_v33 }
 0x4ca   :  { %2616 = vmatpush3.msra.mxu0 %v574_v33  ;;  %v167_v33 = vld [vmem:[%s3866_s3 + $0x50] sm:$0xff] }
 0x4cb   :  { %2618 = vmatmul.mubr.msk.f32.vlgmr.msra.gmra.mrb[4].mxu0 %vm436_vm2, %v558_v35 }
 0x4cc   :  { %2620 = vmatprep.mubr.msk.f32.mxu0 %vm436_vm2, %v559_v34 }
 0x4cf   :  { %2621 = vmatmul.mubr.msk.f32.gmra.mrb[6].mxu0 %vm436_vm2, %v560_v39  ;;  %v2892_v53 = vpop.eup %2891 }
 0x4d0   :  { %2623 = vmatprep.mubr.msk.f32.mxu0 %vm436_vm2, %v561_v41  ;;  %v2894_v55 = vpop.eup %2893  ;;  %v567_v56 = vmul.f32 %v2892_v53, %v3348_v13 }
 0x4d1   :  { %v568_v57 = vmul.f32 %v2894_v55, %v3344_v11 }
 0x4d3   :  { %2624 = vmatmul.mubr.msk.f32.gmra.mrb[8].mxu0 %vm436_vm2, %v562_v37 }
 0x4d4   :  { %2626 = vmatprep.mubr.msk.f32.mxu0 %vm436_vm2, %v563_v47 }
 0x4d7   :  { %2627 = vmatmul.mubr.msk.f32.gmra.mrb[10].mxu0 %vm436_vm2, %v564_v49 }
 0x4d8   :  { %2629 = vmatprep.mubr.msk.f32.mxu0 %vm436_vm2, %v565_v52 }
 0x4db   :  { %2630 = vmatmul.mubr.msk.f32.gmra.mrb[12].mxu0 %vm436_vm2, %v566_v54 }
 0x4dc   :  { %2632 = vmatprep.mubr.msk.f32.mxu0 %vm436_vm2, %v567_v56 }
 0x4df   :  { %2633 = vmatmul.mubr.msk.f32.gmra.mrb[14].mxu0 %vm436_vm2, %v568_v57 }
 0x59e   :  { %v2619_v61 = vpop.f32.mrb[4].mxu0 }
 0x59f   :  { %v680_v63 = vpop.f32.mrb[5].mxu0  ;;  %v740_v15 = vmul.f32 %v2619_v61, %v158_v8 }
 0x5a0   :  { %v739_v3 = vmul.f32 %v680_v63, %v157_v0 }
 0x5a2   :  { %v2622_v2 = vpop.f32.mrb[6].mxu0 }
 0x5a3   :  { %v742_v4 = vmul.f32 %v2622_v2, %v160_v1  ;;  %v690_v5 = vpop.f32.mrb[7].mxu0 }
 0x5a4   :  { %v741_v12 = vmul.f32 %v690_v5, %v159_v6 }
 0x5a5   :  { %v751_v9 = vadd.f32 %v742_v4, %v739_v3 }
 0x5a6   :  { %v2625_v11 = vpop.f32.mrb[8].mxu0 }
 0x5a7   :  { %v744_v13 = vmul.f32 %v2625_v11, %v162_v7  ;;  %v700_v14 = vpop.f32.mrb[9].mxu0  ;;  %v2825_v11 = vld [vmem:[%s3868_s13] sm:$0xff]  }
 0x5a8   :  { %v743_v16 = vmul.f32 %v700_v14, %v161_v10  ;;  %2643 = vmatprep.subr.bf16.mxu0 %v2825_v11 }
 0x5a9   :  { %v753_v18 = vadd.f32 %v744_v13, %v741_v12  ;;  %v2826_v12 = vld [vmem:[%s3868_s13 + $0x8] sm:$0xff]   ;;  %2644 = vmatpush3.bf16.msra.mxu0 %v2825_v11 }
 0x5aa   :  { %v752_v20 = vadd.f32 %v743_v16, %v740_v15  ;;  %v2628_v21 = vpop.f32.mrb[10].mxu0  ;;  %2645 = vmatprep.subr.bf16.mxu0 %v2826_v12 }
 0x5ab   :  { %v746_v22 = vmul.f32 %v2628_v21, %v164_v17  ;;  %v710_v23 = vpop.f32.mrb[11].mxu0 }
 0x5ac   :  { %v745_v24 = vmul.f32 %v710_v23, %v163_v19  ;;  %v2374_v23 = vld [vmem:[%s3869_s11] ss:$0 sm:$0xff] }
 0x5ad   :  { %v755_v58 = vadd.f32 %v752_v20, %v746_v22  ;;  %2646 = vmatpush3.bf16.msra.mxu0 %v2826_v12 }
 0x5ae   :  { %v754_v27 = vadd.f32 %v751_v9, %v745_v24  ;;  %v2631_v29 = vpop.f32.mrb[12].mxu0 }
 0x5af   :  { %v748_v30 = vmul.f32 %v2631_v29, %v166_v25  ;;  %v720_v31 = vpop.f32.mrb[13].mxu0  ;;  %v2375_v29 = vld [vmem:[%s3870_s12] ss:$0 sm:$0xff] }
 0x5b0   :  { %v747_v26 = vmul.f32 %v720_v31, %v165_v50 }
 0x5b1   :  { %v757_v28 = vadd.f32 %v754_v27, %v748_v30 }
 0x5b2   :  { %v756_v35 = vadd.f32 %v753_v18, %v747_v26  ;;  %v2634_v36 = vpop.f32.mrb[14].mxu0 }
 0x5b3   :  { %v750_v34 = vmul.f32 %v2634_v36, %v168_v32  ;;  %v730_v38 = vpop.f32.mrb[15].mxu0 }
 0x5b4   :  { %v749_v39 = vmul.f32 %v730_v38, %v167_v33  ;;  %v2828_v38 = vld [vmem:[%s3871_s15 + $0x8] sm:$0xff]  }
 0x5b5   :  { %v759_v40 = vadd.f32 %v756_v35, %v750_v34  ;;  %v2827_v34 = vld [vmem:[%s3871_s15] sm:$0xff]  }
 0x5b6   :  { %v758_v41 = vadd.f32 %v755_v58, %v749_v39  ;;  %2651 = vmatprep.subr.bf16.mxu1 %v2827_v34  ;;  %v2829_v39 = vld [vmem:[%s3871_s15 + $0x10] sm:$0xff]  }
 0x5b7   :  { %v761_v37 = vpack.c.bf16 %v759_v40, %v759_v40  ;;  %v2830_v40 = vld [vmem:[%s3871_s15 + $0x18] sm:$0xff]  }
 0x5b8   :  { %v760_v42 = vpack.c.bf16 %v758_v41, %v757_v28  ;;  %v2376_v41 = vld [vmem:[%s3872_s14] ss:$0 sm:$0xff] }
 0x5ba   :  { %2639 = vmatprep.mubr.msk.bf16.mxu1 %vm74_vm0, %v760_v42 }
 0x5bb   :  { %2640 = vmatmul.mubr.msk.bf16.vlgmr.msra.gmra.mrb[12].mxu1 %vm74_vm0, %v761_v37 }
 0x5bc   :  { %2652 = vmatpush3.bf16.msra.mxu1 %v2827_v34 }
 0x5bd   :  { %2653 = vmatprep.subr.bf16.mxu1 %v2828_v38 }
 0x5c0   :  { %2654 = vmatpush3.bf16.msra.mxu1 %v2828_v38 }
 0x5c1   :  { %2655 = vmatprep.subr.bf16.mxu1 %v2829_v39 }
 0x5c4   :  { %2656 = vmatpush3.bf16.msra.mxu1 %v2829_v39 }
 0x5c5   :  { %2657 = vmatprep.subr.bf16.mxu1 %v2830_v40 }
 0x5c8   :  { %2658 = vmatpush3.bf16.msra.mxu1 %v2830_v40 }
 0x68e   :  { %v2641_v47 = vpop.f32.mrb[12].mxu1 }
 0x68f   :  { %v825_v48 = vpop.f32.mrb[13].mxu1  ;;  %v834_v49 = vadd.f32 %v2641_v47, %v2369_v46 }
 0x690   :  { %v826_v51 = vadd.f32 %v2369_v46, %v825_v48  ;;  %v2642_v52 = vpop.f32.mrb[14].mxu1 }
 0x691   :  { %v828_v53 = vpop.f32.mrb[15].mxu1  ;;  %v841_v59 = vadd.f32 %v834_v49, %v3157_v43 }
 0x692   :  { %v829_v54 = vadd.f32 %v2369_v46, %v828_v53  ;;  %v839_v55 = vadd.f32 %v826_v51, %v3159_v44 }
 0x693   :  { %v850_v61 = vsel %vm74_vm0, %v841_v59, 0.0 }
 0x694   :  { %v844_v56 = vsel %vm74_vm0, %v839_v55, 0.0  ;;  %v840_v57 = vadd.f32 %v829_v54, %v3161_v45 }
 0x695   :  { %845 = vadd.xlane.f32.xlu1 %v844_v56 }
 0x696   :  { %v847_v60 = vsel %vm74_vm0, %v840_v57, 0.0 }
 0x697   :  { %848 = vadd.xlane.f32.xlu0 %v847_v60 }
 0x699   :  { %851 = vadd.xlane.f32.xlu1 %v850_v61 }
 0x722   :  { %v846_v63 = vpop.xlane.xlu1 %845 }
 0x723   :  { %v853_v0 = vmul.f32 0.03125, %v846_v63 }
 0x724   :  { %v849_v1 = vpop.xlane.xlu0 %848 }
 0x725   :  { %v856_v2 = vsub.f32 %v839_v55, %v853_v0  ;;  %v854_v3 = vmul.f32 0.03125, %v849_v1 }
 0x726   :  { %v852_v4 = vpop.xlane.xlu1 %851 }
 0x727   :  { %v857_v44 = vsub.f32 %v840_v57, %v854_v3  ;;  %v855_v5 = vmul.f32 0.03125, %v852_v4  ;;  %v859_v6 = vmul.f32 %v856_v2, %v856_v2 }
 0x729   :  { %v858_v7 = vsub.f32 %v841_v59, %v855_v5  ;;  %v862_v45 = vsel %vm74_vm0, %v859_v6, 0.0  ;;  %v860_v43 = vmul.f32 %v857_v44, %v857_v44 }
 0x72a   :  { %863 = vadd.xlane.f32.xlu1 %v862_v45 }
 0x72b   :  { %v865_v8 = vsel %vm74_vm0, %v860_v43, 0.0  ;;  %v861_v9 = vmul.f32 %v858_v7, %v858_v7 }
 0x72c   :  { %866 = vadd.xlane.f32.xlu0 %v865_v8 }
 0x72d   :  { %v868_v10 = vsel %vm74_vm0, %v861_v9, 0.0 }
 0x72e   :  { %869 = vadd.xlane.f32.xlu1 %v868_v10 }
 0x7b7   :  { %v864_v13 = vpop.xlane.xlu1 %863 }
 0x7b8   :  { %v871_v14 = vmul.f32 0.03125, %v864_v13 }
 0x7b9   :  { %v867_v15 = vpop.xlane.xlu0 %866 }
 0x7ba   :  { %v874_v16 = vadd.f32 1e-12, %v871_v14  ;;  %v872_v17 = vmul.f32 0.03125, %v867_v15 }
 0x7bb   :  { %v870_v18 = vpop.xlane.xlu1 %869 }
 0x7bc   :  { %2895 = vrsqrt.f32 %v874_v16  ;;  %v875_v19 = vadd.f32 1e-12, %v872_v17  ;;  %v873_v20 = vmul.f32 0.03125, %v870_v18  ;;  %v2381_v16 = vld [vmem:[%s3873_s16] ss:$0 sm:$0xff] }
 0x7be   :  { %2897 = vrsqrt.f32 %v875_v19  ;;  %v876_v21 = vadd.f32 1e-12, %v873_v20 }
 0x7c0   :  { %2899 = vrsqrt.f32 %v876_v21 }
 0x7c6   :  { %v2896_v22 = vpop.eup %2895 }
 0x7c7   :  { %v880_v24 = vmul.f32 %v2896_v22, %v856_v2 }
 0x7c8   :  { %v2898_v25 = vpop.eup %2897 }
 0x7c9   :  { %v881_v58 = vmul.f32 %v2898_v25, %v857_v44  ;;  %v889_v50 = vmul.f32 %v2374_v23, %v880_v24 }
 0x7ca   :  { %v2900_v27 = vpop.eup %2899 }
 0x7cb   :  { %v882_v30 = vmul.f32 %v2900_v27, %v858_v7  ;;  %v890_v31 = vmul.f32 %v2374_v23, %v881_v58  ;;  %v3448_v32 = vadd.f32 %v2375_v29, %v889_v50 }
 0x7cd   :  { %v891_v26 = vmul.f32 %v2374_v23, %v882_v30  ;;  %v3450_v28 = vadd.f32 %v2375_v29, %v890_v31 }
 0x7cf   :  { %v3452_v33 = vadd.f32 %v2375_v29, %v891_v26  ;;  %v901_v35 = vpack.c.bf16 %v3450_v28, %v3448_v32 }
 0x7d1   :  { %v902_v36 = vpack.c.bf16 %v3452_v33, %v3452_v33  ;;  %2647 = vmatprep.mubr.msk.bf16.mxu0 %vm74_vm0, %v901_v35 }
 0x7d3   :  { %2648 = vmatmul.mubr.msk.bf16.vlgmr.msra.gmra.mrb[16].mxu0 %vm74_vm0, %v902_v36 }
 0x8a6   :  { %v2649_v42 = vpop.f32.mrb[16].mxu0 }
 0x8a7   :  { %v975_v37 = vadd.f32 %v2649_v42, %v2376_v41  ;;  %v966_v46 = vpop.f32.mrb[17].mxu0 }
 0x8a8   :  { %v967_v47 = vadd.f32 %v2376_v41, %v966_v46  ;;  %v2650_v48 = vpop.f32.mrb[18].mxu0  ;;  %v2831_v46 = vld [vmem:[%s3891_s30 + $0x10] sm:$0xff]  }
 0x8a9   :  { %v982_v49 = vmul.f32 %v975_v37, %v975_v37  ;;  %v969_v51 = vpop.f32.mrb[19].mxu0  ;;  %2663 = vmatprep.subr.bf16.mxu0 %v2831_v46 }
 0x8aa   :  { %v980_v52 = vmul.f32 %v967_v47, %v967_v47  ;;  %v970_v53 = vadd.f32 %v2376_v41, %v969_v51  ;;  %2664 = vmatpush3.bf16.msra.mxu0 %v2831_v46 }
 0x8ab   :  { %v985_v54 = vmul.f32 %v982_v49, %v975_v37 }
 0x8ac   :  { %v983_v55 = vmul.f32 %v980_v52, %v967_v47  ;;  %v981_v56 = vmul.f32 %v970_v53, %v970_v53 }
 0x8ad   :  { %v988_v57 = vmul.f32 0.044715, %v985_v54 }
 0x8ae   :  { %v986_v59 = vmul.f32 0.044715, %v983_v55  ;;  %v984_v60 = vmul.f32 %v981_v56, %v970_v53 }
 0x8af   :  { %v991_v61 = vadd.f32 %v988_v57, %v975_v37 }
 0x8b0   :  { %v989_v63 = vadd.f32 %v986_v59, %v967_v47  ;;  %v987_v0 = vmul.f32 0.044715, %v984_v60  ;;  %v2388_v60 = vld [vmem:[%s3874_s17] ss:$0 sm:$0xff] }
 0x8b1   :  { %v994_v1 = vmul.f32 0.7978846, %v991_v61 }
 0x8b2   :  { %v992_v2 = vmul.f32 0.7978846, %v989_v63  ;;  %v990_v3 = vadd.f32 %v987_v0, %v970_v53 }
 0x8b3   :  { %2901 = vtanh.f32 %v994_v1 }
 0x8b4   :  { %2903 = vtanh.f32 %v992_v2  ;;  %v993_v4 = vmul.f32 0.7978846, %v990_v3  ;;  %v2389_v3 = vld [vmem:[%s3875_s18] ss:$0 sm:$0xff] }
 0x8b6   :  { %2905 = vtanh.f32 %v993_v4 }
 0x8bd   :  { %v2902_v44 = vpop.eup %2901 }
 0x8be   :  { %v2904_v5 = vpop.eup %2903  ;;  %v1000_v6 = vadd.f32 1.0, %v2902_v44 }
 0x8bf   :  { %v998_v7 = vadd.f32 1.0, %v2904_v5 }
 0x8c0   :  { %v2906_v45 = vpop.eup %2905  ;;  %v1003_v43 = vmul.f32 0.5, %v1000_v6 }
 0x8c1   :  { %v1001_v8 = vmul.f32 0.5, %v998_v7  ;;  %v999_v9 = vadd.f32 1.0, %v2906_v45 }
 0x8c2   :  { %v1006_v11 = vmul.f32 %v1003_v43, %v975_v37 }
 0x8c3   :  { %v1002_v10 = vmul.f32 0.5, %v999_v9  ;;  %v1004_v12 = vmul.f32 %v1001_v8, %v967_v47  ;;  %v2832_v47 = vld [vmem:[%s3891_s30 + $0x18] sm:$0xff]   ;;  %v2395_v9 = vld [vmem:[%s3894_s28 + $0x1] ss:$0 sm:$0xff] }
 0x8c4   :  { %v1008_v15 = vpack.c.bf16 %v1006_v11, %v1006_v11  ;;  %2665 = vmatprep.subr.bf16.mxu0 %v2832_v47 }
 0x8c5   :  { %v1005_v13 = vmul.f32 %v1002_v10, %v970_v53  ;;  %2666 = vmatpush3.bf16.msra.mxu0 %v2832_v47 }
 0x8c7   :  { %v1007_v14 = vpack.c.bf16 %v1005_v13, %v1004_v12 }
 0x8c9   :  { %2659 = vmatprep.mubr.msk.bf16.mxu1 %vm1048_vm3, %v1007_v14 }
 0x8ca   :  { %2660 = vmatmul.mubr.msk.bf16.vlgmr.msra.gmra.mrb[16].mxu1 %vm1048_vm3, %v1008_v15 }
 0x99d   :  { %v2661_v17 = vpop.f32.mrb[16].mxu1 }
 0x99e   :  { %v1089_v18 = vpop.f32.mrb[17].mxu1  ;;  %v1098_v19 = vadd.f32 %v2661_v17, %v2381_v16  ;;  %v2979_v17 = vld [vmem:[%s3895_s8] sm:$0xff] }
 0x99f   :  { %v1090_v20 = vadd.f32 %v2381_v16, %v1089_v18  ;;  %v2662_v21 = vpop.f32.mrb[18].mxu1 }
 0x9a0   :  { %v1092_v22 = vpop.f32.mrb[19].mxu1  ;;  %v1105_v50 = vadd.f32 %v1098_v19, %v3452_v33 }
 0x9a1   :  { %v1093_v23 = vadd.f32 %v2381_v16, %v1092_v22  ;;  %v1103_v24 = vadd.f32 %v1090_v20, %v3448_v32 }
 0x9a2   :  { %v1114_v29 = vsel %vm74_vm0, %v1105_v50, 0.0 }
 0x9a3   :  { %v1108_v25 = vsel %vm74_vm0, %v1103_v24, 0.0  ;;  %v1104_v58 = vadd.f32 %v1093_v23, %v3450_v28 }
 0x9a4   :  { %1109 = vadd.xlane.f32.xlu0 %v1108_v25  ;;  %v2980_v25 = vld [vmem:[%s3895_s8 + $0x8] sm:$0xff] }
 0x9a5   :  { %v1111_v27 = vsel %vm74_vm0, %v1104_v58, 0.0 }
 0x9a6   :  { %1112 = vadd.xlane.f32.xlu1 %v1111_v27 }
 0x9a8   :  { %1115 = vadd.xlane.f32.xlu0 %v1114_v29 }
 0xa31   :  { %v1110_v30 = vpop.xlane.xlu0 %1109 }
 0xa32   :  { %v1117_v31 = vmul.f32 0.03125, %v1110_v30  ;;  %v2983_v30 = vld [vmem:[%s3895_s8 + $0x20] sm:$0xff] }
 0xa33   :  { %v1113_v26 = vpop.xlane.xlu1 %1112 }
 0xa34   :  { %v1120_v35 = vsub.f32 %v1103_v24, %v1117_v31  ;;  %v1118_v36 = vmul.f32 0.03125, %v1113_v26  ;;  %v2984_v26 = vld [vmem:[%s3895_s8 + $0x28] sm:$0xff] }
 0xa35   :  { %v1116_v34 = vpop.xlane.xlu0 %1115 }
 0xa36   :  { %v1121_v32 = vsub.f32 %v1104_v58, %v1118_v36  ;;  %v1119_v38 = vmul.f32 0.03125, %v1116_v34  ;;  %v1123_v39 = vmul.f32 %v1120_v35, %v1120_v35  ;;  %v2985_v36 = vld [vmem:[%s3895_s8 + $0x30] sm:$0xff] }
 0xa38   :  { %v1122_v40 = vsub.f32 %v1105_v50, %v1119_v38  ;;  %v1126_v28 = vsel %vm74_vm0, %v1123_v39, 0.0  ;;  %v1124_v33 = vmul.f32 %v1121_v32, %v1121_v32  ;;  %v2981_v50 = vld [vmem:[%s3895_s8 + $0x10] sm:$0xff]  ;;  %v2987_v39 = vld [vmem:[%s3895_s8 + $0x40] sm:$0xff] }
 0xa39   :  { %1127 = vadd.xlane.f32.xlu1 %v1126_v28  ;;  %v2988_v28 = vld [vmem:[%s3895_s8 + $0x48] sm:$0xff] }
 0xa3a   :  { %v1129_v41 = vsel %vm74_vm0, %v1124_v33, 0.0  ;;  %v1125_v42 = vmul.f32 %v1122_v40, %v1122_v40 }
 0xa3b   :  { %1130 = vadd.xlane.f32.xlu0 %v1129_v41  ;;  %v2989_v41 = vld [vmem:[%s3895_s8 + $0x50] sm:$0xff] }
 0xa3c   :  { %v1132_v37 = vsel %vm74_vm0, %v1125_v42, 0.0 }
 0xa3d   :  { %1133 = vadd.xlane.f32.xlu1 %v1132_v37  ;;  %v2990_v37 = vld [vmem:[%s3895_s8 + $0x58] sm:$0xff] }
 0xac6   :  { %v1128_v48 = vpop.xlane.xlu1 %1127 }
 0xac7   :  { %v1135_v49 = vmul.f32 0.03125, %v1128_v48  ;;  %v2991_v48 = vld [vmem:[%s3864_s1 + $0x8] sm:$0xff] }
 0xac8   :  { %v1131_v51 = vpop.xlane.xlu0 %1130 }
 0xac9   :  { %v1138_v52 = vadd.f32 1e-12, %v1135_v49  ;;  %v1136_v53 = vmul.f32 0.03125, %v1131_v51 }
 0xaca   :  { %v1134_v54 = vpop.xlane.xlu1 %1133 }
 0xacb   :  { %2907 = vrsqrt.f32 %v1138_v52  ;;  %v1139_v55 = vadd.f32 1e-12, %v1136_v53  ;;  %v1137_v56 = vmul.f32 0.03125, %v1134_v54  ;;  %v2992_v52 = vld [vmem:[%s3864_s1] sm:$0xff] }
 0xacd   :  { %2909 = vrsqrt.f32 %v1139_v55  ;;  %v1140_v57 = vadd.f32 1e-12, %v1137_v56 }
 0xacf   :  { %2911 = vrsqrt.f32 %v1140_v57  ;;  %v2993_v57 = vld [vmem:[%s3864_s1 + $0x18] sm:$0xff] }
 0xad5   :  { %v2908_v59 = vpop.eup %2907 }
 0xad6   :  { %v1144_v61 = vmul.f32 %v2908_v59, %v1120_v35 }
 0xad7   :  { %v2910_v63 = vpop.eup %2909 }
 0xad8   :  { %v1145_v0 = vmul.f32 %v2910_v63, %v1121_v32  ;;  %v1153_v1 = vmul.f32 %v2388_v60, %v1144_v61  ;;  %v2986_v32 = vld [vmem:[%s3895_s8 + $0x38] sm:$0xff]  ;;  %v2994_v61 = vld [vmem:[%s3864_s1 + $0x10] sm:$0xff] }
 0xad9   :  { %v2912_v2 = vpop.eup %2911 }
 0xada   :  { %v1146_v4 = vmul.f32 %v2912_v2, %v1122_v40  ;;  %v1154_v44 = vmul.f32 %v2388_v60, %v1145_v0  ;;  %v3501_v5 = vadd.f32 %v2389_v3, %v1153_v1 }
 0xadc   :  { %v3503_v6 = vadd.f32 %v2389_v3, %v1154_v44  ;;  %v1155_v7 = vmul.f32 %v2388_v60, %v1146_v4 }
 0xade   :  { %v1165_v45 = vpack.c.bf16 %v3503_v6, %v3501_v5  ;;  %v3507_v43 = vadd.f32 %v2389_v3, %v1155_v7  ;;  %v2995_v3 = vld [vmem:[%s3864_s1 + $0x28] sm:$0xff]  ;;  %v2996_v7 = vld [vmem:[%s3864_s1 + $0x20] sm:$0xff] }
 0xae0   :  { %2667 = vmatprep.mubr.msk.bf16.mxu0 %vm74_vm0, %v1165_v45  ;;  %v1166_v8 = vpack.c.bf16 %v3507_v43, %v3507_v43 }
 0xae2   :  { %2668 = vmatmul.mubr.msk.bf16.vlgmr.msra.gmra.mrb[20].mxu0 %vm74_vm0, %v1166_v8 }
 0xbb5   :  { %v2669_v10 = vpop.f32.mrb[20].mxu0 }
 0xbb6   :  { %v3516_v11 = vadd.f32 %v2669_v10, %v2395_v9  ;;  %v1232_v12 = vpop.f32.mrb[21].mxu0 }
 0xbb7   :  { %v1233_v13 = vadd.f32 %v2395_v9, %v1232_v12  ;;  %v2670_v14 = vpop.f32.mrb[22].mxu0  ;;  %v2997_v12 = vld [vmem:[%s3864_s1 + $0x38] sm:$0xff] }
 0xbb8   :  { %1265 = vrot.lane.b32.xlu1 %v3516_v11, %s3015_s2  ;;  %v1235_v15 = vpop.f32.mrb[23].mxu0  ;;  %v1248_v27 = vmul.f32 %v2981_v50, %v3516_v11  ;;  %v1251_v35 = vmul.f32 %v2984_v26, %v3516_v11  ;;  %v1254_v40 = vmul.f32 %v2987_v39, %v3516_v11  ;;  %v1257_v46 = vmul.f32 %v2990_v37, %v3516_v11 }
 0xbb9   :  { %v1236_v16 = vadd.f32 %v2395_v9, %v1235_v15  ;;  %v1246_v18 = vmul.f32 %v2979_v17, %v1233_v13  ;;  %v1249_v29 = vmul.f32 %v2982_v62, %v1233_v13  ;;  %v1252_v34 = vmul.f32 %v2985_v36, %v1233_v13  ;;  %v2998_v15 = vld [vmem:[%s3864_s1 + $0x30] sm:$0xff]  ;;  %v3001_v62 = vld [vmem:[%s3864_s1 + $0x58] sm:$0xff] }
 0xbba   :  { %v1255_v33 = vmul.f32 %v2988_v28, %v1233_v13 }
 0xbbb   :  { %2677 = vmatprep.mubr.msk.f32.mxu0 %vm74_vm0, %v1246_v18  ;;  %v3524_v19 = vpack.i.bf16 %v1236_v16, %v1233_v13  ;;  %v1247_v58 = vmul.f32 %v2980_v25, %v1236_v16  ;;  %v1250_v31 = vmul.f32 %v2983_v30, %v1236_v16  ;;  %v1253_v38 = vmul.f32 %v2986_v32, %v1236_v16 }
 0xbbc   :  { %v1256_v42 = vmul.f32 %v2989_v41, %v1236_v16 }
 0xbbd   :  { %2812 = vrot.lane.b32.xlu0 %v3524_v19, %s3015_s2 }
 0xc2a   :  { %v1266_v24 = vpop.permute.xlu1 %1265 }
 0xc2f   :  { %v2813_v20 = vpop.permute.xlu0 %2812 }
 0xc30   :  { %v2815_v21 = vunpack.i.h.bf16 %v2813_v20  ;;  %v2814_v22 = vunpack.i.l.bf16 %v2813_v20 }
 0xc32   :  { %v2777_v23 = vpack.c.bf16 %v2815_v21, %v2814_v22  ;;  %v2999_v21 = vld [vmem:[%s3864_s1 + $0x48] sm:$0xff] }
 0xc34   :  { %2779 = vmatprep.subr.msk.bf16.mxu0 %vm3186_vm1, %v2777_v23 }
 0xc35   :  { %2782 = vmatpush3.bf16.xpose.msk.msra.mxu0 %vm3186_vm1, %v2777_v23 }
 0xc36   :  { %2675 = vmatprep.subr.msk.mxu0 %vm74_vm0, %v1266_v24 }
 0xc3d   :  { %2676 = vmatpush3.xpose.msk.msra.mxu0 %vm74_vm0, %v1266_v24  ;;  %v3000_v24 = vld [vmem:[%s3864_s1 + $0x40] sm:$0xff] }
 0xc40   :  { %2678 = vmatmul.mubr.msk.f32.vlgmr.msra.gmra.mrb[24].mxu0 %vm74_vm0, %v1247_v58 }
 0xc41   :  { %2680 = vmatprep.mubr.msk.f32.mxu0 %vm74_vm0, %v1248_v27 }
 0xc44   :  { %2681 = vmatmul.mubr.msk.f32.gmra.mrb[26].mxu0 %vm74_vm0, %v1249_v29 }
 0xc45   :  { %2683 = vmatprep.mubr.msk.f32.mxu0 %vm74_vm0, %v1250_v31  ;;  %v3002_v31 = vld [vmem:[%s3864_s1 + $0x50] sm:$0xff] }
 0xc48   :  { %2684 = vmatmul.mubr.msk.f32.gmra.mrb[28].mxu0 %vm74_vm0, %v1251_v35 }
 0xc49   :  { %2686 = vmatprep.mubr.msk.f32.mxu0 %vm74_vm0, %v1252_v34 }
 0xc4c   :  { %2687 = vmatmul.mubr.msk.f32.gmra.mrb[30].mxu0 %vm74_vm0, %v1253_v38 }
 0xc4d   :  { %2689 = vmatprep.mubr.msk.f32.mxu0 %vm74_vm0, %v1254_v40 }
 0xc50   :  { %2690 = vmatmul.mubr.msk.f32.gmra.mrb[32].mxu0 %vm74_vm0, %v1255_v33 }
 0xc51   :  { %2692 = vmatprep.mubr.msk.f32.mxu0 %vm74_vm0, %v1256_v42 }
 0xc54   :  { %2693 = vmatmul.mubr.msk.f32.gmra.mrb[34].mxu0 %vm74_vm0, %v1257_v46 }
 0xd13   :  { %v2679_v47 = vpop.f32.mrb[24].mxu0 }
 0xd14   :  { %v1381_v49 = vadd.f32 %v2991_v48, %v2679_v47  ;;  %v1375_v51 = vpop.f32.mrb[25].mxu0 }
 0xd15   :  { %v1376_v53 = vadd.f32 %v2992_v52, %v1375_v51 }
 0xd16   :  { %v1437_v54 = vsel %vm436_vm2, %v1381_v49, -inf }
 0xd17   :  { %1438 = vmax.xlane.f32.xlu0 %v1437_v54  ;;  %v2682_v55 = vpop.f32.mrb[26].mxu0  ;;  %v1434_v56 = vsel %vm436_vm2, %v1376_v53, -inf }
 0xd18   :  { %v1391_v59 = vadd.f32 %v2993_v57, %v2682_v55  ;;  %v1385_v60 = vpop.f32.mrb[27].mxu0  ;;  %1435 = vmax.xlane.f32.xlu1 %v1434_v56 }
 0xd19   :  { %v1386_v63 = vadd.f32 %v2994_v61, %v1385_v60 }
 0xd1a   :  { %v1443_v0 = vsel %vm436_vm2, %v1391_v59, -inf }
 0xd1b   :  { %v2685_v1 = vpop.f32.mrb[28].mxu0  ;;  %v1440_v2 = vsel %vm436_vm2, %v1386_v63, -inf }
 0xd1c   :  { %v1401_v4 = vadd.f32 %v2995_v3, %v2685_v1  ;;  %v1395_v44 = vpop.f32.mrb[29].mxu0  ;;  %1441 = vmax.xlane.f32.xlu0 %v1440_v2  ;;  %1444 = vmax.xlane.f32.xlu1 %v1443_v0 }
 0xd1d   :  { %v1396_v45 = vadd.f32 %v2996_v7, %v1395_v44 }
 0xd1e   :  { %v1449_v8 = vsel %vm436_vm2, %v1401_v4, -inf }
 0xd1f   :  { %v2688_v9 = vpop.f32.mrb[30].mxu0  ;;  %v1446_v10 = vsel %vm436_vm2, %v1396_v45, -inf }
 0xd20   :  { %v1411_v13 = vadd.f32 %v2997_v12, %v2688_v9  ;;  %v1405_v14 = vpop.f32.mrb[31].mxu0  ;;  %1447 = vmax.xlane.f32.xlu0 %v1446_v10  ;;  %1450 = vmax.xlane.f32.xlu1 %v1449_v8 }
 0xd21   :  { %v1406_v16 = vadd.f32 %v2998_v15, %v1405_v14 }
 0xd22   :  { %v1455_v17 = vsel %vm436_vm2, %v1411_v13, -inf }
 0xd23   :  { %v2691_v18 = vpop.f32.mrb[32].mxu0  ;;  %v1452_v20 = vsel %vm436_vm2, %v1406_v16, -inf }
 0xd24   :  { %v3617_v22 = vadd.f32 %v2999_v21, %v2691_v18  ;;  %v1415_v23 = vpop.f32.mrb[33].mxu0  ;;  %1453 = vmax.xlane.f32.xlu0 %v1452_v20  ;;  %1456 = vmax.xlane.f32.xlu1 %v1455_v17 }
 0xd25   :  { %v1416_v25 = vadd.f32 %v3000_v24, %v1415_v23 }
 0xd26   :  { %v1461_v58 = vsel %vm436_vm2, %v3617_v22, -inf }
 0xd27   :  { %v2694_v50 = vpop.f32.mrb[34].mxu0  ;;  %v1458_v27 = vsel %vm436_vm2, %v1416_v25, -inf }
 0xd28   :  { %v3628_v29 = vadd.f32 %v3001_v62, %v2694_v50  ;;  %v1425_v30 = vpop.f32.mrb[35].mxu0  ;;  %1459 = vmax.xlane.f32.xlu0 %v1458_v27  ;;  %1462 = vmax.xlane.f32.xlu1 %v1461_v58 }
 0xd29   :  { %v3633_v26 = vadd.f32 %v3002_v31, %v1425_v30 }
 0xd2a   :  { %v1467_v35 = vsel %vm436_vm2, %v3628_v29, -inf }
 0xd2b   :  { %v1464_v36 = vsel %vm436_vm2, %v3633_v26, -inf }
 0xd2c   :  { %1465 = vmax.xlane.f32.xlu0 %v1464_v36  ;;  %1468 = vmax.xlane.f32.xlu1 %v1467_v35 }
 0xda4   :  { %v1439_v34 = vpop.xlane.xlu0 %1438 }
 0xda5   :  { %v1471_v32 = vsub.f32 %v1381_v49, %v1439_v34  ;;  %v1436_v38 = vpop.xlane.xlu1 %1435 }
 0xda6   :  { %v1470_v39 = vsub.f32 %v1376_v53, %v1436_v38 }
 0xda7   :  { %v1484_v40 = vmul.f32 1.442695, %v1471_v32 }
 0xda8   :  { %v1482_v28 = vmul.f32 1.442695, %v1470_v39 }
 0xda9   :  { %2913 = vpow2.f32 %v1484_v40  ;;  %v1442_v33 = vpop.xlane.xlu0 %1441  ;;  %v1445_v41 = vpop.xlane.xlu1 %1444 }
 0xdaa   :  { %2915 = vpow2.f32 %v1482_v28  ;;  %v1472_v42 = vsub.f32 %v1386_v63, %v1442_v33  ;;  %v1473_v37 = vsub.f32 %v1391_v59, %v1445_v41 }
 0xdac   :  { %v1486_v46 = vmul.f32 1.442695, %v1472_v42  ;;  %v1488_v47 = vmul.f32 1.442695, %v1473_v37 }
 0xdad   :  { %v1448_v48 = vpop.xlane.xlu0 %1447  ;;  %v1451_v51 = vpop.xlane.xlu1 %1450 }
 0xdae   :  { %2917 = vpow2.f32 %v1486_v46  ;;  %v1474_v52 = vsub.f32 %v1396_v45, %v1448_v48  ;;  %v1475_v54 = vsub.f32 %v1401_v4, %v1451_v51 }
 0xdaf   :  { %2919 = vpow2.f32 %v1488_v47 }
 0xdb0   :  { %v1490_v55 = vmul.f32 1.442695, %v1474_v52  ;;  %v1492_v49 = vmul.f32 1.442695, %v1475_v54 }
 0xdb1   :  { %v1454_v56 = vpop.xlane.xlu0 %1453  ;;  %v1457_v53 = vpop.xlane.xlu1 %1456 }
 0xdb2   :  { %2921 = vpow2.f32 %v1490_v55  ;;  %v1476_v57 = vsub.f32 %v1406_v16, %v1454_v56  ;;  %v1477_v60 = vsub.f32 %v1411_v13, %v1457_v53 }
 0xdb3   :  { %v3639_v61 = vpop.eup %2913  ;;  %2923 = vpow2.f32 %v1492_v49 }
 0xdb4   :  { %v3641_v63 = vpop.eup %2915  ;;  %v1494_v59 = vmul.f32 1.442695, %v1476_v57  ;;  %v1496_v0 = vmul.f32 1.442695, %v1477_v60  ;;  %v1509_v1 = vsel %vm436_vm2, %v3639_v61, 0.0 }
 0xdb5   :  { %v1460_v2 = vpop.xlane.xlu0 %1459  ;;  %1510 = vadd.xlane.f32.xlu1 %v1509_v1  ;;  %v1463_v3 = vpop.xlane.xlu1 %1462  ;;  %v1506_v4 = vsel %vm436_vm2, %v3641_v63, 0.0 }
 0xdb6   :  { %2925 = vpow2.f32 %v1494_v59  ;;  %v1478_v44 = vsub.f32 %v1416_v25, %v1460_v2  ;;  %v1479_v7 = vsub.f32 %v3617_v22, %v1463_v3  ;;  %1507 = vadd.xlane.f32.xlu0 %v1506_v4 }
 0xdb7   :  { %2927 = vpow2.f32 %v1496_v0 }
 0xdb8   :  { %v3648_v45 = vpop.eup %2917  ;;  %v1498_v8 = vmul.f32 1.442695, %v1478_v44  ;;  %v1500_v9 = vmul.f32 1.442695, %v1479_v7 }
 0xdb9   :  { %v3650_v10 = vpop.eup %2919  ;;  %v1466_v12 = vpop.xlane.xlu0 %1465  ;;  %v1512_v14 = vsel %vm436_vm2, %v3648_v45, 0.0 }
 0xdba   :  { %v1469_v13 = vpop.xlane.xlu1 %1468  ;;  %2929 = vpow2.f32 %v1498_v8  ;;  %v1480_v15 = vsub.f32 %v3633_v26, %v1466_v12  ;;  %1513 = vadd.xlane.f32.xlu0 %v1512_v14  ;;  %v1515_v17 = vsel %vm436_vm2, %v3650_v10, 0.0 }
 0xdbb   :  { %v1481_v16 = vsub.f32 %v3628_v29, %v1469_v13  ;;  %2931 = vpow2.f32 %v1500_v9  ;;  %1516 = vadd.xlane.f32.xlu1 %v1515_v17  ;;  %v2834_v17 = vld [vmem:[%s3865_s9 + $0x18] sm:$0xff]  }
 0xdbc   :  { %v3658_v18 = vpop.eup %2921  ;;  %v1502_v22 = vmul.f32 1.442695, %v1480_v15 }
 0xdbd   :  { %v1504_v20 = vmul.f32 1.442695, %v1481_v16  ;;  %v3660_v21 = vpop.eup %2923  ;;  %v1518_v23 = vsel %vm436_vm2, %v3658_v18, 0.0  ;;  %v2833_v16 = vld [vmem:[%s3865_s9 + $0x10] sm:$0xff]  }
 0xdbe   :  { %1519 = vadd.xlane.f32.xlu0 %v1518_v23  ;;  %v1521_v24 = vsel %vm436_vm2, %v3660_v21, 0.0  ;;  %2719 = vmatprep.subr.bf16.mxu0 %v2833_v16 }
 0xdbf   :  { %2933 = vpow2.f32 %v1504_v20  ;;  %1522 = vadd.xlane.f32.xlu1 %v1521_v24  ;;  %2720 = vmatpush3.bf16.msra.mxu0 %v2833_v16  ;;  %v3004_v24 = vld [vmem:[%s3866_s3 + $0x18] sm:$0xff] }
 0xdc0   :  { %v3666_v25 = vpop.eup %2925  ;;  %2935 = vpow2.f32 %v1502_v22  ;;  %2721 = vmatprep.subr.bf16.mxu0 %v2834_v17  ;;  %v3003_v22 = vld [vmem:[%s3866_s3] sm:$0xff] }
 0xdc1   :  { %v3668_v58 = vpop.eup %2927  ;;  %v1524_v50 = vsel %vm436_vm2, %v3666_v25, 0.0 }
 0xdc2   :  { %1525 = vadd.xlane.f32.xlu0 %v1524_v50  ;;  %v1527_v27 = vsel %vm436_vm2, %v3668_v58, 0.0 }
 0xdc3   :  { %1528 = vadd.xlane.f32.xlu1 %v1527_v27  ;;  %2722 = vmatpush3.bf16.msra.mxu0 %v2834_v17 }
 0xdc4   :  { %v3674_v62 = vpop.eup %2929 }
 0xdc5   :  { %v3676_v29 = vpop.eup %2931  ;;  %v1530_v30 = vsel %vm436_vm2, %v3674_v62, 0.0 }
 0xdc6   :  { %1531 = vadd.xlane.f32.xlu0 %v1530_v30  ;;  %v1533_v31 = vsel %vm436_vm2, %v3676_v29, 0.0  ;;  %v3006_v30 = vld [vmem:[%s3866_s3 + $0x28] sm:$0xff] }
 0xdc7   :  { %1534 = vadd.xlane.f32.xlu1 %v1533_v31 }
 0xdc9   :  { %v3682_v26 = vpop.eup %2933 }
 0xdca   :  { %v1539_v35 = vsel %vm436_vm2, %v3682_v26, 0.0  ;;  %v3686_v36 = vpop.eup %2935 }
 0xdcb   :  { %1540 = vadd.xlane.f32.xlu0 %v1539_v35  ;;  %v1536_v34 = vsel %vm436_vm2, %v3686_v36, 0.0  ;;  %v3007_v35 = vld [vmem:[%s3866_s3 + $0x8] sm:$0xff] }
 0xdcf   :  { %1537 = vadd.xlane.f32.xlu0 %v1536_v34  ;;  %v3008_v34 = vld [vmem:[%s3866_s3 + $0x20] sm:$0xff] }
 0xdd8   :  { %2817 = vrot.lane.b32.xlu1 %v3524_v19, %s3016_s7 }
 0xde5   :  { %1570 = vrot.lane.b32.xlu0 %v3516_v11, %s3016_s7 }
 0xe42   :  { %v1511_v32 = vpop.xlane.xlu1 %1510 }
 0xe43   :  { %v1508_v38 = vpop.xlane.xlu0 %1507 }
 0xe44   :  { %2937 = vrcp.f32 %v1508_v38 }
 0xe45   :  { %2939 = vrcp.f32 %v1511_v32 }
 0xe47   :  { %v1514_v39 = vpop.xlane.xlu0 %1513 }
 0xe48   :  { %v1517_v40 = vpop.xlane.xlu1 %1516  ;;  %2941 = vrcp.f32 %v1514_v39 }
 0xe49   :  { %2943 = vrcp.f32 %v1517_v40 }
 0xe4b   :  { %v1520_v28 = vpop.xlane.xlu0 %1519 }
 0xe4c   :  { %v1523_v33 = vpop.xlane.xlu1 %1522  ;;  %2945 = vrcp.f32 %v1520_v28  ;;  %v3009_v28 = vld [vmem:[%s3866_s3 + $0x38] sm:$0xff] }
 0xe4d   :  { %2947 = vrcp.f32 %v1523_v33 }
 0xe4e   :  { %v2938_v41 = vpop.eup %2937 }
 0xe4f   :  { %v1526_v42 = vpop.xlane.xlu0 %1525  ;;  %v1554_v37 = vmul.f32 %v2938_v41, %v3641_v63  ;;  %v2940_v49 = vpop.eup %2939 }
 0xe50   :  { %v1529_v46 = vpop.xlane.xlu1 %1528  ;;  %2949 = vrcp.f32 %v1526_v42  ;;  %v1555_v57 = vmul.f32 %v2940_v49, %v3639_v61  ;;  %v3010_v42 = vld [vmem:[%s3866_s3 + $0x30] sm:$0xff] }
 0xe51   :  { %2701 = vmatprep.mubr.msk.f32.mxu1 %vm436_vm2, %v1554_v37  ;;  %2951 = vrcp.f32 %v1529_v46 }
 0xe52   :  { %v2942_v56 = vpop.eup %2941 }
 0xe53   :  { %v1532_v47 = vpop.xlane.xlu0 %1531  ;;  %v2944_v60 = vpop.eup %2943  ;;  %v1556_v63 = vmul.f32 %v2942_v56, %v3648_v45 }
 0xe54   :  { %v1535_v19 = vpop.xlane.xlu1 %1534  ;;  %2953 = vrcp.f32 %v1532_v47  ;;  %v1557_v0 = vmul.f32 %v2944_v60, %v3650_v10 }
 0xe55   :  { %2955 = vrcp.f32 %v1535_v19 }
 0xe56   :  { %v2946_v59 = vpop.eup %2945 }
 0xe57   :  { %v2948_v1 = vpop.eup %2947  ;;  %v1558_v2 = vmul.f32 %v2946_v59, %v3658_v18 }
 0xe58   :  { %v1541_v11 = vpop.xlane.xlu0 %1540  ;;  %v2818_v48 = vpop.permute.xlu1 %2817  ;;  %v1559_v61 = vmul.f32 %v2948_v1, %v3660_v21 }
 0xe59   :  { %v2820_v51 = vunpack.i.h.bf16 %v2818_v48  ;;  %v2819_v52 = vunpack.i.l.bf16 %v2818_v48 }
 0xe5a   :  { %v2950_v3 = vpop.eup %2949 }
 0xe5b   :  { %v2783_v54 = vpack.c.bf16 %v2820_v51, %v2819_v52  ;;  %v2952_v4 = vpop.eup %2951  ;;  %v1560_v44 = vmul.f32 %v2950_v3, %v3666_v25  ;;  %v3012_v52 = vld [vmem:[%s3866_s3 + $0x40] sm:$0xff] }
 0xe5c   :  { %v1538_v55 = vpop.xlane.xlu0 %1537  ;;  %v1561_v45 = vmul.f32 %v2952_v4, %v3668_v58 }
 0xe5d   :  { %2784 = vmatprep.subr.bf16.mxu1 %v2783_v54  ;;  %2957 = vrcp.f32 %v1538_v55 }
 0xe5e   :  { %2786 = vmatpush3.bf16.msra.mxu1 %v2783_v54  ;;  %2959 = vrcp.f32 %v1541_v11  ;;  %v2954_v7 = vpop.eup %2953  ;;  %v3011_v11 = vld [vmem:[%s3866_s3 + $0x48] sm:$0xff] }
 0xe5f   :  { %v2956_v8 = vpop.eup %2955  ;;  %v1562_v9 = vmul.f32 %v2954_v7, %v3674_v62  ;;  %v3005_v62 = vld [vmem:[%s3866_s3 + $0x10] sm:$0xff] }
 0xe60   :  { %v1571_v53 = vpop.permute.xlu0 %1570  ;;  %v1563_v12 = vmul.f32 %v2956_v8, %v3676_v29 }
 0xe61   :  { %2699 = vmatprep.subr.mxu1 %v1571_v53 }
 0xe62   :  { %2700 = vmatpush3.msra.mxu1 %v1571_v53  ;;  %v3013_v53 = vld [vmem:[%s3866_s3 + $0x58] sm:$0xff] }
 0xe63   :  { %2702 = vmatmul.mubr.msk.f32.vlgmr.msra.gmra.mrb[20].mxu1 %vm436_vm2, %v1555_v57 }
 0xe64   :  { %2704 = vmatprep.mubr.msk.f32.mxu1 %vm436_vm2, %v1556_v63  ;;  %v3014_v63 = vld [vmem:[%s3866_s3 + $0x50] sm:$0xff] }
 0xe67   :  { %2705 = vmatmul.mubr.msk.f32.gmra.mrb[22].mxu1 %vm436_vm2, %v1557_v0  ;;  %v2958_v10 = vpop.eup %2957 }
 0xe68   :  { %2707 = vmatprep.mubr.msk.f32.mxu1 %vm436_vm2, %v1558_v2  ;;  %v2960_v13 = vpop.eup %2959  ;;  %v1564_v14 = vmul.f32 %v2958_v10, %v3686_v36 }
 0xe69   :  { %v1565_v15 = vmul.f32 %v2960_v13, %v3682_v26 }
 0xe6b   :  { %2708 = vmatmul.mubr.msk.f32.gmra.mrb[24].mxu1 %vm436_vm2, %v1559_v61  ;;  %v2432_v61 = vld [vmem:[%s3867_s10 + $0x1] ss:$0 sm:$0xff] }
 0xe6c   :  { %2710 = vmatprep.mubr.msk.f32.mxu1 %vm436_vm2, %v1560_v44 }
 0xe6f   :  { %2711 = vmatmul.mubr.msk.f32.gmra.mrb[26].mxu1 %vm436_vm2, %v1561_v45 }
 0xe70   :  { %2713 = vmatprep.mubr.msk.f32.mxu1 %vm436_vm2, %v1562_v9 }
 0xe73   :  { %2714 = vmatmul.mubr.msk.f32.gmra.mrb[28].mxu1 %vm436_vm2, %v1563_v12 }
 0xe74   :  { %2716 = vmatprep.mubr.msk.f32.mxu1 %vm436_vm2, %v1564_v14 }
 0xe77   :  { %2717 = vmatmul.mubr.msk.f32.gmra.mrb[30].mxu1 %vm436_vm2, %v1565_v15 }
 0xf36   :  { %v2703_v18 = vpop.f32.mrb[20].mxu1 }
 0xf37   :  { %v1677_v20 = vpop.f32.mrb[21].mxu1  ;;  %v1737_v36 = vmul.f32 %v3007_v35, %v2703_v18 }
 0xf38   :  { %v1736_v23 = vmul.f32 %v3003_v22, %v1677_v20 }
 0xf3a   :  { %v2706_v21 = vpop.f32.mrb[22].mxu1 }
 0xf3b   :  { %v1739_v25 = vmul.f32 %v3004_v24, %v2706_v21  ;;  %v1687_v58 = vpop.f32.mrb[23].mxu1 }
 0xf3c   :  { %v1738_v29 = vmul.f32 %v3005_v62, %v1687_v58 }
 0xf3d   :  { %v1748_v50 = vadd.f32 %v1739_v25, %v1736_v23 }
 0xf3e   :  { %v2709_v27 = vpop.f32.mrb[24].mxu1 }
 0xf3f   :  { %v1741_v31 = vmul.f32 %v3006_v30, %v2709_v27  ;;  %v1697_v26 = vpop.f32.mrb[25].mxu1  ;;  %v2835_v30 = vld [vmem:[%s3868_s13 + $0x10] sm:$0xff]  }
 0xf40   :  { %v1740_v32 = vmul.f32 %v3008_v34, %v1697_v26  ;;  %2727 = vmatprep.subr.bf16.mxu1 %v2835_v30 }
 0xf41   :  { %v1750_v38 = vadd.f32 %v1741_v31, %v1738_v29  ;;  %v2836_v31 = vld [vmem:[%s3868_s13 + $0x18] sm:$0xff]   ;;  %2728 = vmatpush3.bf16.msra.mxu1 %v2835_v30 }
 0xf42   :  { %v1749_v39 = vadd.f32 %v1740_v32, %v1737_v36  ;;  %v2712_v40 = vpop.f32.mrb[26].mxu1  ;;  %2729 = vmatprep.subr.bf16.mxu1 %v2836_v31 }
 0xf43   :  { %v1743_v33 = vmul.f32 %v3009_v28, %v2712_v40  ;;  %v1707_v41 = vpop.f32.mrb[27].mxu1 }
 0xf44   :  { %v1742_v37 = vmul.f32 %v3010_v42, %v1707_v41  ;;  %v2439_v41 = vld [vmem:[%s3869_s11 + $0x1] ss:$0 sm:$0xff] }
 0xf45   :  { %v1752_v46 = vadd.f32 %v1749_v39, %v1743_v33  ;;  %2730 = vmatpush3.bf16.msra.mxu1 %v2836_v31 }
 0xf46   :  { %v1751_v47 = vadd.f32 %v1748_v50, %v1742_v37  ;;  %v2715_v19 = vpop.f32.mrb[28].mxu1 }
 0xf47   :  { %v1745_v48 = vmul.f32 %v3011_v11, %v2715_v19  ;;  %v1717_v51 = vpop.f32.mrb[29].mxu1  ;;  %v2440_v11 = vld [vmem:[%s3870_s12 + $0x1] ss:$0 sm:$0xff] }
 0xf48   :  { %v1744_v54 = vmul.f32 %v3012_v52, %v1717_v51 }
 0xf49   :  { %v1754_v55 = vadd.f32 %v1751_v47, %v1745_v48 }
 0xf4a   :  { %v1753_v49 = vadd.f32 %v1750_v38, %v1744_v54  ;;  %v2718_v56 = vpop.f32.mrb[30].mxu1 }
 0xf4b   :  { %v1747_v57 = vmul.f32 %v3013_v53, %v2718_v56  ;;  %v1727_v60 = vpop.f32.mrb[31].mxu1 }
 0xf4c   :  { %v1746_v59 = vmul.f32 %v3014_v63, %v1727_v60  ;;  %v2838_v60 = vld [vmem:[%s3871_s15 + $0x28] sm:$0xff]   ;;  %v2839_v63 = vld [vmem:[%s3871_s15 + $0x30] sm:$0xff]  }
 0xf4d   :  { %v1756_v0 = vadd.f32 %v1753_v49, %v1747_v57  ;;  %v2837_v57 = vld [vmem:[%s3871_s15 + $0x20] sm:$0xff]  }
 0xf4e   :  { %v1755_v1 = vadd.f32 %v1752_v46, %v1746_v59  ;;  %2735 = vmatprep.subr.bf16.mxu0 %v2837_v57  ;;  %v2840_v59 = vld [vmem:[%s3871_s15 + $0x38] sm:$0xff]  }
 0xf4f   :  { %v1758_v3 = vpack.c.bf16 %v1756_v0, %v1756_v0  ;;  %v2446_v0 = vld [vmem:[%s3872_s14 + $0x1] ss:$0 sm:$0xff] }
 0xf50   :  { %v1757_v2 = vpack.c.bf16 %v1755_v1, %v1754_v55 }
 0xf52   :  { %2723 = vmatprep.mubr.msk.bf16.mxu0 %vm74_vm0, %v1757_v2 }
 0xf53   :  { %2724 = vmatmul.mubr.msk.bf16.vlgmr.msra.gmra.mrb[36].mxu0 %vm74_vm0, %v1758_v3 }
 0xf54   :  { %2736 = vmatpush3.bf16.msra.mxu0 %v2837_v57 }
 0xf55   :  { %2737 = vmatprep.subr.bf16.mxu0 %v2838_v60 }
 0xf58   :  { %2738 = vmatpush3.bf16.msra.mxu0 %v2838_v60 }
 0xf59   :  { %2739 = vmatprep.subr.bf16.mxu0 %v2839_v63 }
 0xf5c   :  { %2740 = vmatpush3.bf16.msra.mxu0 %v2839_v63 }
 0xf5d   :  { %2741 = vmatprep.subr.bf16.mxu0 %v2840_v59 }
 0xf60   :  { %2742 = vmatpush3.bf16.msra.mxu0 %v2840_v59 }
0x1026   :  { %v2725_v4 = vpop.f32.mrb[36].mxu0 }
0x1027   :  { %v1824_v44 = vpop.f32.mrb[37].mxu0  ;;  %v1833_v7 = vadd.f32 %v2725_v4, %v2432_v61 }
0x1028   :  { %v1825_v45 = vadd.f32 %v2432_v61, %v1824_v44  ;;  %v2726_v8 = vpop.f32.mrb[38].mxu0 }
0x1029   :  { %v1827_v9 = vpop.f32.mrb[39].mxu0  ;;  %v1840_v15 = vadd.f32 %v1833_v7, %v3507_v43 }
0x102a   :  { %v1828_v10 = vadd.f32 %v2432_v61, %v1827_v9  ;;  %v1838_v12 = vadd.f32 %v1825_v45, %v3501_v5 }
0x102b   :  { %v1851_v17 = vsel %vm74_vm0, %v1840_v15, 0.0 }
0x102c   :  { %v1845_v13 = vsel %vm74_vm0, %v1838_v12, 0.0  ;;  %v1839_v14 = vadd.f32 %v1828_v10, %v3503_v6 }
0x102d   :  { %1846 = vadd.xlane.f32.xlu1 %v1845_v13 }
0x102e   :  { %v1848_v16 = vsel %vm74_vm0, %v1839_v14, 0.0 }
0x102f   :  { %1849 = vadd.xlane.f32.xlu0 %v1848_v16 }
0x1031   :  { %1852 = vadd.xlane.f32.xlu1 %v1851_v17 }
0x10ba   :  { %v1847_v18 = vpop.xlane.xlu1 %1846 }
0x10bb   :  { %v1854_v20 = vmul.f32 0.03125, %v1847_v18 }
0x10bc   :  { %v1850_v21 = vpop.xlane.xlu0 %1849 }
0x10bd   :  { %v1857_v22 = vsub.f32 %v1838_v12, %v1854_v20  ;;  %v1855_v23 = vmul.f32 0.03125, %v1850_v21 }
0x10be   :  { %v1853_v24 = vpop.xlane.xlu1 %1852 }
0x10bf   :  { %v1858_v5 = vsub.f32 %v1839_v14, %v1855_v23  ;;  %v1856_v25 = vmul.f32 0.03125, %v1853_v24  ;;  %v1860_v58 = vmul.f32 %v1857_v22, %v1857_v22 }
0x10c1   :  { %v1859_v50 = vsub.f32 %v1840_v15, %v1856_v25  ;;  %v1863_v6 = vsel %vm74_vm0, %v1860_v58, 0.0  ;;  %v1861_v43 = vmul.f32 %v1858_v5, %v1858_v5 }
0x10c2   :  { %1864 = vadd.xlane.f32.xlu1 %v1863_v6 }
0x10c3   :  { %v1866_v27 = vsel %vm74_vm0, %v1861_v43, 0.0  ;;  %v1862_v62 = vmul.f32 %v1859_v50, %v1859_v50 }
0x10c4   :  { %1867 = vadd.xlane.f32.xlu0 %v1866_v27 }
0x10c5   :  { %v1869_v29 = vsel %vm74_vm0, %v1862_v62, 0.0 }
0x10c6   :  { %1870 = vadd.xlane.f32.xlu1 %v1869_v29 }
0x114f   :  { %v1865_v26 = vpop.xlane.xlu1 %1864 }
0x1150   :  { %v1872_v35 = vmul.f32 0.03125, %v1865_v26 }
0x1151   :  { %v1868_v36 = vpop.xlane.xlu0 %1867 }
0x1152   :  { %v1875_v34 = vadd.f32 1e-12, %v1872_v35  ;;  %v1873_v32 = vmul.f32 0.03125, %v1868_v36  ;;  %v2460_v36 = vld [vmem:[%s3873_s16 + $0x1] ss:$0 sm:$0xff] }
0x1153   :  { %v1871_v38 = vpop.xlane.xlu1 %1870 }
0x1154   :  { %2961 = vrsqrt.f32 %v1875_v34  ;;  %v1876_v39 = vadd.f32 1e-12, %v1873_v32  ;;  %v1874_v40 = vmul.f32 0.03125, %v1871_v38 }
0x1156   :  { %2963 = vrsqrt.f32 %v1876_v39  ;;  %v1877_v28 = vadd.f32 1e-12, %v1874_v40 }
0x1158   :  { %2965 = vrsqrt.f32 %v1877_v28 }
0x115e   :  { %v2962_v33 = vpop.eup %2961 }
0x115f   :  { %v1881_v42 = vmul.f32 %v2962_v33, %v1857_v22 }
0x1160   :  { %v2964_v37 = vpop.eup %2963 }
0x1161   :  { %v1882_v46 = vmul.f32 %v2964_v37, %v1858_v5  ;;  %v1890_v47 = vmul.f32 %v2439_v41, %v1881_v42 }
0x1162   :  { %v2966_v19 = vpop.eup %2965 }
0x1163   :  { %v1883_v48 = vmul.f32 %v2966_v19, %v1859_v50  ;;  %v1891_v51 = vmul.f32 %v2439_v41, %v1882_v46  ;;  %v3786_v54 = vadd.f32 %v2440_v11, %v1890_v47 }
0x1165   :  { %v1892_v52 = vmul.f32 %v2439_v41, %v1883_v48  ;;  %v3788_v55 = vadd.f32 %v2440_v11, %v1891_v51 }
0x1167   :  { %v3790_v49 = vadd.f32 %v2440_v11, %v1892_v52  ;;  %v1902_v56 = vpack.c.bf16 %v3788_v55, %v3786_v54 }
0x1169   :  { %v1903_v53 = vpack.c.bf16 %v3790_v49, %v3790_v49  ;;  %2731 = vmatprep.mubr.msk.bf16.mxu1 %vm74_vm0, %v1902_v56 }
0x116b   :  { %2732 = vmatmul.mubr.msk.bf16.vlgmr.msra.gmra.mrb[32].mxu1 %vm74_vm0, %v1903_v53 }
0x123e   :  { %v2733_v1 = vpop.f32.mrb[32].mxu1 }
0x123f   :  { %v1978_v2 = vadd.f32 %v2733_v1, %v2446_v0  ;;  %v1969_v3 = vpop.f32.mrb[33].mxu1 }
0x1240   :  { %v1970_v61 = vadd.f32 %v2446_v0, %v1969_v3  ;;  %v2734_v4 = vpop.f32.mrb[34].mxu1  ;;  %v3019_v3 = vmov 0.0  }
0x1241   :  { %v1985_v44 = vmul.f32 %v1978_v2, %v1978_v2  ;;  %v1972_v7 = vpop.f32.mrb[35].mxu1  ;;  %2753 = vmatprep.mubr.msk.f32.mxu1 %vm3018_vm4, %v3019_v3 }
0x1242   :  { %v1983_v45 = vmul.f32 %v1970_v61, %v1970_v61  ;;  %v1973_v8 = vadd.f32 %v2446_v0, %v1972_v7 }
0x1243   :  { %v1988_v9 = vmul.f32 %v1985_v44, %v1978_v2 }
0x1244   :  { %v1986_v10 = vmul.f32 %v1983_v45, %v1970_v61  ;;  %v1984_v12 = vmul.f32 %v1973_v8, %v1973_v8 }
0x1245   :  { %v1991_v13 = vmul.f32 0.044715, %v1988_v9 }
0x1246   :  { %v1989_v14 = vmul.f32 0.044715, %v1986_v10  ;;  %v1987_v15 = vmul.f32 %v1984_v12, %v1973_v8 }
0x1247   :  { %v1994_v16 = vadd.f32 %v1991_v13, %v1978_v2 }
0x1248   :  { %v1992_v17 = vadd.f32 %v1989_v14, %v1970_v61  ;;  %v1990_v18 = vmul.f32 0.044715, %v1987_v15  ;;  %v2469_v14 = vld [vmem:[%s3874_s17 + $0x1] ss:$0 sm:$0xff] }
0x1249   :  { %v1997_v20 = vmul.f32 0.7978846, %v1994_v16 }
0x124a   :  { %v1995_v21 = vmul.f32 0.7978846, %v1992_v17  ;;  %v1993_v22 = vadd.f32 %v1990_v18, %v1973_v8 }
0x124b   :  { %2967 = vtanh.f32 %v1997_v20 }
0x124c   :  { %2969 = vtanh.f32 %v1995_v21  ;;  %v1996_v23 = vmul.f32 0.7978846, %v1993_v22  ;;  %v2470_v21 = vld [vmem:[%s3875_s18 + $0x1] ss:$0 sm:$0xff] }
0x124e   :  { %2971 = vtanh.f32 %v1996_v23 }
0x1255   :  { %v2968_v24 = vpop.eup %2967 }
0x1256   :  { %v2970_v5 = vpop.eup %2969  ;;  %v2003_v25 = vadd.f32 1.0, %v2968_v24 }
0x1257   :  { %v2001_v58 = vadd.f32 1.0, %v2970_v5 }
0x1258   :  { %v2972_v50 = vpop.eup %2971  ;;  %v2006_v6 = vmul.f32 0.5, %v2003_v25 }
0x1259   :  { %v2004_v43 = vmul.f32 0.5, %v2001_v58  ;;  %v2002_v27 = vadd.f32 1.0, %v2972_v50  ;;  %v2245_v50 = vld [vmem:[%s3876_s19] sm:$0xff] }
0x125a   :  { %v2009_v29 = vmul.f32 %v2006_v6, %v1978_v2  ;;  %v3017_v2 = vmov 0.0|0.0   ;;  %v2246_v6 = vld [vmem:[%s3876_s19 + $0x8] sm:$0xff] }
0x125b   :  { %v2005_v62 = vmul.f32 0.5, %v2002_v27  ;;  %v2007_v30 = vmul.f32 %v2004_v43, %v1970_v61  ;;  %2787 = vmatprep.subr.bf16.mxu1 %v3017_v2  ;;  %v2171_v27 = vld [vmem:[%s3877_s4] sm:$0x7] }
0x125c   :  { %v2011_v35 = vpack.c.bf16 %v2009_v29, %v2009_v29  ;;  %v2247_v29 = vld [vmem:[%s3876_s19 + $0x10] sm:$0xff] }
0x125d   :  { %v2008_v31 = vmul.f32 %v2005_v62, %v1973_v8  ;;  %v2791_v62 = vpack.c.bf16 %v2246_v6, %v2245_v50 }
0x125f   :  { %v2010_v26 = vpack.c.bf16 %v2008_v31, %v2007_v30  ;;  %v2248_v30 = vld [vmem:[%s3876_s19 + $0x18] sm:$0xff] }
0x1260   :  { %v2794_v31 = vpack.c.bf16 %v2248_v30, %v2247_v29 }
0x1261   :  { %2743 = vmatprep.mubr.msk.bf16.mxu0 %vm1048_vm3, %v2010_v26 }
0x1262   :  { %2744 = vmatmul.mubr.msk.bf16.vlgmr.msra.gmra.mrb[40].mxu0 %vm1048_vm3, %v2011_v35 }
0x1335   :  { %v2745_v34 = vpop.f32.mrb[40].mxu0 }
0x1336   :  { %v2093_v32 = vpop.f32.mrb[41].mxu0  ;;  %v2102_v38 = vadd.f32 %v2745_v34, %v2460_v36 }
0x1337   :  { %v2094_v39 = vadd.f32 %v2460_v36, %v2093_v32  ;;  %v2746_v40 = vpop.f32.mrb[42].mxu0 }
0x1338   :  { %v2096_v28 = vpop.f32.mrb[43].mxu0  ;;  %v2109_v46 = vadd.f32 %v2102_v38, %v3790_v49 }
0x1339   :  { %v2097_v33 = vadd.f32 %v2460_v36, %v2096_v28  ;;  %v2107_v41 = vadd.f32 %v2094_v39, %v3786_v54  ;;  %v2472_v36 = vld [vmem:[%s3878_s20] ss:$0 sm:$0xff] }
0x133a   :  { %v2120_v19 = vsel %vm74_vm0, %v2109_v46, 0.0 }
0x133b   :  { %v2114_v42 = vsel %vm74_vm0, %v2107_v41, 0.0  ;;  %v2108_v37 = vadd.f32 %v2097_v33, %v3788_v55 }
0x133c   :  { %2115 = vadd.xlane.f32.xlu0 %v2114_v42 }
0x133d   :  { %v2117_v47 = vsel %vm74_vm0, %v2108_v37, 0.0 }
0x133e   :  { %2118 = vadd.xlane.f32.xlu1 %v2117_v47 }
0x1340   :  { %2121 = vadd.xlane.f32.xlu0 %v2120_v19 }
0x13c9   :  { %v2116_v11 = vpop.xlane.xlu0 %2115 }
0x13ca   :  { %v2123_v48 = vmul.f32 0.03125, %v2116_v11 }
0x13cb   :  { %v2119_v51 = vpop.xlane.xlu1 %2118 }
0x13cc   :  { %v2126_v52 = vsub.f32 %v2107_v41, %v2123_v48  ;;  %v2124_v56 = vmul.f32 0.03125, %v2119_v51 }
0x13cd   :  { %v2122_v53 = vpop.xlane.xlu0 %2121 }
0x13ce   :  { %v2127_v54 = vsub.f32 %v2108_v37, %v2124_v56  ;;  %v2125_v57 = vmul.f32 0.03125, %v2122_v53  ;;  %v2129_v60 = vmul.f32 %v2126_v52, %v2126_v52 }
0x13d0   :  { %v2128_v63 = vsub.f32 %v2109_v46, %v2125_v57  ;;  %v2132_v55 = vsel %vm74_vm0, %v2129_v60, 0.0  ;;  %v2130_v49 = vmul.f32 %v2127_v54, %v2127_v54 }
0x13d1   :  { %2133 = vadd.xlane.f32.xlu1 %v2132_v55 }
0x13d2   :  { %v2135_v59 = vsel %vm74_vm0, %v2130_v49, 0.0  ;;  %v2131_v0 = vmul.f32 %v2128_v63, %v2128_v63 }
0x13d3   :  { %2136 = vadd.xlane.f32.xlu0 %v2135_v59 }
0x13d4   :  { %v2138_v1 = vsel %vm74_vm0, %v2131_v0, 0.0 }
0x13d5   :  { %2139 = vadd.xlane.f32.xlu1 %v2138_v1 }
0x145e   :  { %v2134_v61 = vpop.xlane.xlu1 %2133 }
0x145f   :  { %v2141_v4 = vmul.f32 0.03125, %v2134_v61 }
0x1460   :  { %v2137_v44 = vpop.xlane.xlu0 %2136 }
0x1461   :  { %v2144_v7 = vadd.f32 1e-12, %v2141_v4  ;;  %v2142_v45 = vmul.f32 0.03125, %v2137_v44 }
0x1462   :  { %v2140_v8 = vpop.xlane.xlu1 %2139 }
0x1463   :  { %2973 = vrsqrt.f32 %v2144_v7  ;;  %v2145_v9 = vadd.f32 1e-12, %v2142_v45  ;;  %v2143_v10 = vmul.f32 0.03125, %v2140_v8 }
0x1465   :  { %2975 = vrsqrt.f32 %v2145_v9  ;;  %v2146_v12 = vadd.f32 1e-12, %v2143_v10 }
0x1467   :  { %2977 = vrsqrt.f32 %v2146_v12 }
0x146d   :  { %v2974_v13 = vpop.eup %2973 }
0x146e   :  { %v2150_v15 = vmul.f32 %v2974_v13, %v2126_v52 }
0x146f   :  { %v2976_v16 = vpop.eup %2975 }
0x1470   :  { %v2151_v17 = vmul.f32 %v2976_v16, %v2127_v54  ;;  %v2159_v18 = vmul.f32 %v2469_v14, %v2150_v15 }
0x1471   :  { %v2978_v20 = vpop.eup %2977 }
0x1472   :  { %v2160_v22 = vmul.f32 %v2469_v14, %v2151_v17  ;;  %v2152_v23 = vmul.f32 %v2978_v20, %v2128_v63  ;;  %v2168_v24 = vadd.f32 %v2470_v21, %v2159_v18 }
0x1474   :  { %v2169_v5 = vadd.f32 %v2470_v21, %v2160_v22  ;;  %v2161_v58 = vmul.f32 %v2469_v14, %v2152_v23 }
0x1476   :  { %v2788_v25 = vpack.c.bf16 %v2169_v5, %v2168_v24  ;;  %v2170_v43 = vadd.f32 %v2470_v21, %v2161_v58 }
0x1478   :  { %2789 = vmatpush3.bf16.msra.mxu1 %v2788_v25 }
0x1479   :  { %2751 = vmatprep.subr.mxu1 %v3019_v3 }
0x147c   :  { %2752 = vmatpush3.msra.mxu1 %v2170_v43 }
0x147d   :  { %2754 = vmatmul.mubr.msk.f32.vlgmr.msra.gmra.mrb[36].mxu1 %vm436_vm2, %v2171_v27  ;;  %2790 = vmatprep.subr.bf16.mxu1 %v3017_v2 }
0x147e   :  { %2792 = vmatpush3.bf16.msra.mxu1 %v2791_v62  ;;  %2764 = vmatprep.mubr.msk.f32.mxu1 %vm3018_vm4, %v3019_v3 }
0x147f   :  { %2793 = vmatprep.subr.bf16.mxu1 %v3017_v2 }
0x1482   :  { %2795 = vmatpush3.bf16.msra.mxu1 %v2794_v31 }
0x1550   :  { %v2241_v26 = vpop.f32.mrb[36].mxu1 }
0x1551   :  { %v2755_v35 = vpop.f32.mrb[37].mxu1  ;;  %2765 = vmatmul.mubr.msk.f32.vlgmr.msra.gmra.mrb[38].mxu1 %vm74_vm0, %v2241_v26 }
0x1624   :  { %v2325_v34 = vpop.f32.mrb[38].mxu1 }
0x1625   :  { %v2326_v32 = vadd.f32 %v2472_v36, %v2325_v34  ;;  %v2766_v38 = vpop.f32.mrb[39].mxu1 }
0x1627   :  { %2330 = vst.msk [vmem:[%s3879_s21] sm:$0x7] %vm2329_vm5, %v2326_v32 }

</bundles_post_ra>
